<compile_context>
chip_gen: v6e
topology: v6e:2x2x1
jax: 0.10.0
libtpu: 0.0.40
codegen_flags: <defaults>
</compile_context>

<pallas_src>
import math

import jax
import jax.numpy as jnp
from jax.experimental import pallas as pl
from jax.experimental.pallas import tpu as pltpu

# ---------------- configuration (small, CLEVR-flavoured) ----------------
WINDOW, BATCH = 2, 4
N = WINDOW * BATCH                    # 8 rows = one sublane group
INPUT_SIZE = 16                       # 2 pos + 8 cats + 2 cats + 2 pairs of 2
INPUT_DIVIDE = (8, 8)                 # per-tube input slice widths
HIDDEN = (32, 32)                     # FF_MLP mlp_layer_para = [[32], [32]]
HTOT = sum(HIDDEN)
OUTPUT_DIVIDE = (12, 12)              # per-tube GSVIB width
OUTPUT_SIZE = sum(OUTPUT_DIVIDE)
GS_HEADS = ((3, 4), (6, 2))           # (gs_head_num, gs_head_dim) per tube
NOISE_STD = 0.002
TEMP = math.exp(-5.0)                 # gumbel-softmax temperature (schedule=1.0)
LN_EPS = 1e-5
INV_SQRT_01 = 1.0 / math.sqrt(0.1)
BIG_NEG = -1e30

assert HIDDEN[0] == HIDDEN[1]

# packed per-row input layout (one full (8,128) f32 tile)
PIN_WIDTH = 128
GG_OFF = INPUT_SIZE                   # 16: gumbel noise for the 24 GSVIB lanes
OBJN_OFF = INPUT_SIZE + OUTPUT_SIZE   # 40: objN scaling factor

# segment start columns for the fused masked softmaxes
_N_PAIRS = (INPUT_SIZE - 12) // 2
PRE_SEG_STARTS = (0, 1, 2, 10) + tuple(12 + 2 * p for p in range(_N_PAIRS))


def _gs_starts():
    starts, off = [], 0
    for hnum, hdim in GS_HEADS:
        for _ in range(hnum):
            starts.append(off)
            off += hdim
    return tuple(starts)


GS_SEG_STARTS = _gs_starts()


# ---------------- fused building blocks (traced inside the kernel) -------
def _segment_masks(length, seg_starts):
    """(L,L) same-segment indicator (f32) and additive big-negative mask."""
    row = jax.lax.broadcasted_iota(jnp.int32, (length, length), 0)
    col = jax.lax.broadcasted_iota(jnp.int32, (length, length), 1)
    seg_r = jnp.zeros((length, length), jnp.int32)
    seg_c = jnp.zeros((length, length), jnp.int32)
    for b in seg_starts[1:]:
        seg_r = seg_r + (row >= b).astype(jnp.int32)
        seg_c = seg_c + (col >= b).astype(jnp.int32)
    same = seg_r == seg_c
    return same.astype(jnp.float32), jnp.where(same, 0.0, BIG_NEG)


def _segment_softmax(s, same_f32, neg_mask, recip=None):
    """Numerically-stable softmax over lane segments of s: (N, L)."""
    t = s[:, None, :] + neg_mask[None, :, :]              # (N, L, L)
    m = jnp.max(t, axis=-1)                               # per-lane segment max
    e = jnp.exp(s - m)
    denom = jnp.sum(e[:, None, :] * same_f32[None, :, :], axis=-1)
    if recip is None:
        return e / denom
    return e * recip(denom)


def _two_segment_layernorm(h, gamma, beta, seg_len):
    """LayerNorm applied independently to lanes [0:seg_len) and [seg_len:)."""
    lane = jax.lax.broadcasted_iota(jnp.int32, (1, h.shape[-1]), 1)
    m0 = (lane < seg_len).astype(h.dtype)
    m1 = 1.0 - m0
    inv = 1.0 / seg_len
    mu = (jnp.sum(h * m0, axis=-1, keepdims=True) * m0 +
          jnp.sum(h * m1, axis=-1, keepdims=True) * m1) * inv
    xc = h - mu
    sq = xc * xc
    var = (jnp.sum(sq * m0, axis=-1, keepdims=True) * m0 +
           jnp.sum(sq * m1, axis=-1, keepdims=True) * m1) * inv
    return xc * jax.lax.rsqrt(var + LN_EPS) * gamma + beta


def _fused_forward(pin, wmat, vecs, recip_final=None):
    """Fused multitube forward on packed operands."""
    z = pin[:, 0:INPUT_SIZE]                              # x + all input noise
    gg = pin[:, GG_OFF:GG_OFF + OUTPUT_SIZE]              # GSVIB gumbel noise
    objn = pin[:, OBJN_OFF:OBJN_OFF + 1]                  # objN per row

    w1 = wmat[0:INPUT_SIZE, :]                            # bf16 (16,64) blk-diag
    w2 = wmat[INPUT_SIZE:, 0:OUTPUT_SIZE]                 # bf16 (64,24) blk-diag
    b1 = vecs[0:1, :]
    gamma = vecs[1:2, :]
    beta = vecs[2:3, :]
    b2 = vecs[3:4, 0:OUTPUT_SIZE]

    # preprocessing: Gaussian-noised positions pass through; every categorical
    # segment handled by ONE fused masked gumbel-softmax (noise pre-added).
    same_p, neg_p = _segment_masks(INPUT_SIZE, PRE_SEG_STARTS)
    soft = _segment_softmax(z / TEMP, same_p, neg_p)
    lane = jax.lax.broadcasted_iota(jnp.int32, z.shape, 1)
    d = jnp.where(lane < 2, z, soft)
    d = (d - 0.45) * 2.0                                  # (x - 0.45)/sqrt(0.25)
    xin = (d - 0.5) * 2.0                                 # FF_MLP input norm

    # both FF_MLP tubes as block-diagonal bf16 GEMMs (f32 accumulate on MXU)
    h = jnp.dot(xin.astype(jnp.bfloat16), w1,
                preferred_element_type=jnp.float32) + b1
    hn = _two_segment_layernorm(h, gamma, beta, HIDDEN[0])
    hr = jnp.maximum(hn, 0.0)
    datam = jnp.dot(hr.astype(jnp.bfloat16), w2,
                    preferred_element_type=jnp.float32) + b2

    # GSVIB heads: per-head log_softmax dropped (softmax is shift-invariant);
    # all 9 heads done as ONE fused masked gumbel-softmax.
    same_o, neg_o = _segment_masks(OUTPUT_SIZE, GS_SEG_STARTS)
    p = _segment_softmax((datam + gg) / TEMP, same_o, neg_o, recip=recip_final)

    out = p * objn
    return (out - 0.3) * INV_SQRT_01


# ---------------- Pallas kernel ------------------------------------------
def multitube_kernel(pin_ref, wmat_ref, vecs_ref, out_ref):
    out_ref[...] = _fused_forward(
        pin_ref[...], wmat_ref[...], vecs_ref[...],
        recip_final=lambda x: pl.reciprocal(x, approx=True))


# ---------------- wrapper-side packing ------------------------------------
def pack_rows(datax, objNl, noise):
    """All per-row tensors -> one lane-dense (N, 128) f32 tile."""
    gnoise, g0, g1, g2, gga, ggb = noise
    xf = datax.reshape(N, INPUT_SIZE).astype(jnp.float32)
    z = xf + jnp.concatenate([gnoise, g0, g1, g2], axis=-1)
    gg = jnp.concatenate([gga, ggb], axis=-1)
    objn = objNl.reshape(N).astype(jnp.float32)
    pin = jnp.zeros((N, PIN_WIDTH), jnp.float32)
    pin = pin.at[:, 0:INPUT_SIZE].set(z)
    pin = pin.at[:, GG_OFF:GG_OFF + OUTPUT_SIZE].set(gg)
    pin = pin.at[:, OBJN_OFF].set(objn)
    return pin


def pack_params(params):
    """14 small parameter arrays -> one bf16 matrix slab + one f32 vector slab."""
    in_off = (0, INPUT_DIVIDE[0])
    h_off = (0, HIDDEN[0])
    out_off = (0, OUTPUT_DIVIDE[0])
    wmat = jnp.zeros((INPUT_SIZE + HTOT, HTOT), jnp.float32)
    vecs = jnp.zeros((8, HTOT), jnp.float32)
    for t, (w1, b1, lg, lb, w2, b2) in enumerate(params):
        i0, h0, o0 = in_off[t], h_off[t], out_off[t]
        di, dh, do = INPUT_DIVIDE[t], HIDDEN[t], OUTPUT_DIVIDE[t]
        wmat = wmat.at[i0:i0 + di, h0:h0 + dh].set(w1)
        wmat = wmat.at[INPUT_SIZE + h0:INPUT_SIZE + h0 + dh, o0:o0 + do].set(w2)
        vecs = vecs.at[0, h0:h0 + dh].set(b1[0])
        vecs = vecs.at[1, h0:h0 + dh].set(lg[0])
        vecs = vecs.at[2, h0:h0 + dh].set(lb[0])
        vecs = vecs.at[3, o0:o0 + do].set(b2[0])
    return wmat.astype(jnp.bfloat16), vecs


def multitube_forward_pallas(datax, objNl, params, noise):
    pin = pack_rows(datax, objNl, noise)
    wmat, vecs = pack_params(params)
    vmem = pl.BlockSpec(memory_space=pltpu.MemorySpace.VMEM)
    out = pl.pallas_call(
        multitube_kernel,
        out_shape=jax.ShapeDtypeStruct((N, OUTPUT_SIZE), jnp.float32),
        in_specs=[vmem, vmem, vmem],
        out_specs=vmem,
    )(pin, wmat, vecs)
    return out.reshape(WINDOW, BATCH, OUTPUT_SIZE)


# ---------------- pure-JAX reference (original structure) -----------------
def _log_softmax(x):
    m = jnp.max(x, axis=-1, keepdims=True)
    s = x - m
    return s - jnp.log(jnp.sum(jnp.exp(s), axis=-1, keepdims=True))


def _gumbel_softmax(x, g, temp):
    b = (x + g) / temp
    b = b - jnp.max(b, axis=-1, keepdims=True)
    e = jnp.exp(b)
    return e / jnp.sum(e, axis=-1, keepdims=True)


def _layernorm(x, gamma, beta):
    mu = jnp.mean(x, axis=-1, keepdims=True)
    var = jnp.mean((x - mu) ** 2, axis=-1, keepdims=True)
    return (x - mu) * jax.lax.rsqrt(var + LN_EPS) * gamma + beta


def multitube_forward_ref(datax, objNl, params, noise):
    """Mirrors the original per-tube / per-head structure (slices, log_softmax,
    concatenates).  Matmul operands cast to bf16 to match the kernel's MXU."""
    gnoise, g0, g1, g2, gga, ggb = noise
    gg_all = (gga, ggb)
    xf = datax.reshape(N, INPUT_SIZE).astype(jnp.float32)
    objn = objNl.reshape(N, 1).astype(jnp.float32)

    outputp = xf[:, 0:2] + gnoise
    out0 = _gumbel_softmax(xf[:, 2:10], g0, TEMP)
    out1 = _gumbel_softmax(xf[:, 10:12], g1, TEMP)
    pair_cols = [_gumbel_softmax(xf[:, 12 + 2 * p:14 + 2 * p],
                                 g2[:, 2 * p:2 * p + 2], TEMP)
                 for p in range(_N_PAIRS)]
    d = jnp.concatenate([outputp, out0, out1] + pair_cols, axis=-1)
    d = (d - 0.45) / jnp.sqrt(0.25)

    outs, start = [], 0
    for t, (w1, b1, lg, lb, w2, b2) in enumerate(params):
        div = INPUT_DIVIDE[t]
        xin = (d[:, start:start + div] - 0.5) / jnp.sqrt(0.25)
        start += div
        h = jnp.dot(xin.astype(jnp.bfloat16), w1.astype(jnp.bfloat16),
                    preferred_element_type=jnp.float32) + b1
        h = jnp.maximum(_layernorm(h, lg, lb), 0.0)
        datam = jnp.dot(h.astype(jnp.bfloat16), w2.astype(jnp.bfloat16),
                        preferred_element_type=jnp.float32) + b2
        hnum, hdim = GS_HEADS[t]
        heads = []
        for hh in range(hnum):
            c = _log_softmax(datam[:, hh * hdim:(hh + 1) * hdim])
            heads.append(_gumbel_softmax(
                c, gg_all[t][:, hh * hdim:(hh + 1) * hdim], TEMP))
        outs.append(jnp.concatenate(heads, axis=-1))

    out = jnp.concatenate(outs, axis=-1) * objn
    out = (out - 0.3) / jnp.sqrt(0.1)
    return out.reshape(WINDOW, BATCH, OUTPUT_SIZE)


# ---------------- parameters & noise ---------------------------------------
def init_params(key):
    params = []
    for t in range(len(INPUT_DIVIDE)):
        kin, hid, kout = INPUT_DIVIDE[t], HIDDEN[t], OUTPUT_DIVIDE[t]
        key, k1, k2, k3, k4 = jax.random.split(key, 5)
        w1 = jax.random.uniform(k1, (kin, hid), jnp.float32, -1.0, 1.0) / jnp.sqrt(kin)
        b1 = jax.random.uniform(k2, (1, hid), jnp.float32, -1.0, 1.0) / jnp.sqrt(kin)
        lg = jnp.ones((1, hid), jnp.float32)
        lb = jnp.zeros((1, hid), jnp.float32)
        w2 = jax.random.uniform(k3, (hid, kout), jnp.float32, -1.0, 1.0) / jnp.sqrt(hid)
        b2 = jax.random.uniform(k4, (1, kout), jnp.float32, -1.0, 1.0) / jnp.sqrt(hid)
        params.append((w1, b1, lg, lb, w2, b2))
    return tuple(params)


def make_noise(key):
    k_gauss, k0, k1, k2, kg0, kg1 = jax.random.split(key, 6)

    def gumbel(k, shape):
        u = jax.random.uniform(k, shape, jnp.float32, 1e-10, 1.0 - 1e-7)
        return -jnp.log(-jnp.log(u))

    gnoise = jax.random.normal(k_gauss, (N, 2), jnp.float32) * NOISE_STD
    g0 = gumbel(k0, (N, 8))
    g1 = gumbel(k1, (N, 2))
    g2 = gumbel(k2, (N, INPUT_SIZE - 12))
    gga = gumbel(kg0, (N, OUTPUT_DIVIDE[0]))
    ggb = gumbel(kg1, (N, OUTPUT_DIVIDE[1]))
    return gnoise, g0, g1, g2, gga, ggb


if __name__ == "__main__":
    root = jax.random.PRNGKey(0)
    k_data, k_obj, k_param, k_noise = jax.random.split(root, 4)

    # datax ~ CLEVR-style attribute encoding in [0, 1); objNl ~ object counts.
    datax = jax.random.uniform(k_data, (WINDOW, BATCH, INPUT_SIZE), jnp.float32)
    objNl = jax.random.randint(k_obj, (WINDOW, BATCH), 1, 5).astype(jnp.float32)

    params = init_params(k_param)
    noise = make_noise(k_noise)

    out = jax.block_until_ready(multitube_forward_pallas(datax, objNl, params, noise))
    ref = jax.block_until_ready(multitube_forward_ref(datax, objNl, params, noise))

    assert out.shape == (WINDOW, BATCH, OUTPUT_SIZE)
    assert bool(jnp.all(jnp.isfinite(out)))
    # Tolerance note: the kernel uses pl.reciprocal(approx=True) on the final
    # softmax normalization and mathematically-identical-but-restructured
    # reductions; the exp(-5) temperature amplifies tiny rounding differences,
    # so compare at ~1e-2 instead of 1e-3.
    assert bool(jnp.allclose(out, ref, rtol=1e-2, atol=2e-2)), "mismatch vs reference"

    print("KERNEL_OK")
</pallas_src>

<mosaic_0001>
module attributes {stable_mosaic.version = 11 : i64} {
  func.func @multitube_kernel(%arg0: memref<8x128xf32, #tpu.memory_space<vmem>>, %arg1: memref<80x64xbf16, #tpu.memory_space<vmem>>, %arg2: memref<8x64xf32, #tpu.memory_space<vmem>>, %arg3: memref<8x24xf32, #tpu.memory_space<vmem>>) attributes {dimension_semantics = [], scalar_prefetch = 0 : i64, scratch_operands = 0 : i64, tpu.core_type = #tpu.core_type<tc>} {
    %c0 = arith.constant 0 : index
    %c0_0 = arith.constant 0 : index
    %0 = vector.load %arg0[%c0, %c0_0] : memref<8x128xf32, #tpu.memory_space<vmem>>, vector<8x128xf32>
    %c0_1 = arith.constant 0 : index
    %c0_2 = arith.constant 0 : index
    %1 = vector.load %arg1[%c0_1, %c0_2] : memref<80x64xbf16, #tpu.memory_space<vmem>>, vector<80x64xbf16>
    %c0_3 = arith.constant 0 : index
    %c0_4 = arith.constant 0 : index
    %2 = vector.load %arg2[%c0_3, %c0_4] : memref<8x64xf32, #tpu.memory_space<vmem>>, vector<8x64xf32>
    %3 = vector.extract_strided_slice %0 {offsets = [0, 0], sizes = [8, 16], strides = [1, 1]} : vector<8x128xf32> to vector<8x16xf32>
    %4 = vector.extract_strided_slice %0 {offsets = [0, 16], sizes = [8, 24], strides = [1, 1]} : vector<8x128xf32> to vector<8x24xf32>
    %5 = vector.extract_strided_slice %0 {offsets = [0, 40], sizes = [8, 1], strides = [1, 1]} : vector<8x128xf32> to vector<8x1xf32>
    %6 = vector.extract_strided_slice %1 {offsets = [0, 0], sizes = [16, 64], strides = [1, 1]} : vector<80x64xbf16> to vector<16x64xbf16>
    %7 = vector.extract_strided_slice %1 {offsets = [16, 0], sizes = [64, 24], strides = [1, 1]} : vector<80x64xbf16> to vector<64x24xbf16>
    %8 = vector.extract_strided_slice %2 {offsets = [0, 0], sizes = [1, 64], strides = [1, 1]} : vector<8x64xf32> to vector<1x64xf32>
    %9 = vector.extract_strided_slice %2 {offsets = [1, 0], sizes = [1, 64], strides = [1, 1]} : vector<8x64xf32> to vector<1x64xf32>
    %10 = vector.extract_strided_slice %2 {offsets = [2, 0], sizes = [1, 64], strides = [1, 1]} : vector<8x64xf32> to vector<1x64xf32>
    %11 = vector.extract_strided_slice %2 {offsets = [3, 0], sizes = [1, 24], strides = [1, 1]} : vector<8x64xf32> to vector<1x24xf32>
    %12 = tpu.iota {dimensions = array<i32: 0>} : vector<16x16xi32>
    %13 = tpu.iota {dimensions = array<i32: 1>} : vector<16x16xi32>
    %c0_i32 = arith.constant 0 : i32
    %14 = vector.broadcast %c0_i32 : i32 to vector<16x16xi32>
    %c0_i32_5 = arith.constant 0 : i32
    %15 = vector.broadcast %c0_i32_5 : i32 to vector<16x16xi32>
    %c1_i32 = arith.constant 1 : i32
    %16 = vector.broadcast %c1_i32 : i32 to vector<16x16xi32>
    %17 = arith.cmpi sge, %12, %16 : vector<16x16xi32>
    %18 = arith.extui %17 : vector<16x16xi1> to vector<16x16xi32>
    %19 = arith.addi %14, %18 : vector<16x16xi32>
    %c1_i32_6 = arith.constant 1 : i32
    %20 = vector.broadcast %c1_i32_6 : i32 to vector<16x16xi32>
    %21 = arith.cmpi sge, %13, %20 : vector<16x16xi32>
    %22 = arith.extui %21 : vector<16x16xi1> to vector<16x16xi32>
    %23 = arith.addi %15, %22 : vector<16x16xi32>
    %c2_i32 = arith.constant 2 : i32
    %24 = vector.broadcast %c2_i32 : i32 to vector<16x16xi32>
    %25 = arith.cmpi sge, %12, %24 : vector<16x16xi32>
    %26 = arith.extui %25 : vector<16x16xi1> to vector<16x16xi32>
    %27 = arith.addi %19, %26 : vector<16x16xi32>
    %c2_i32_7 = arith.constant 2 : i32
    %28 = vector.broadcast %c2_i32_7 : i32 to vector<16x16xi32>
    %29 = arith.cmpi sge, %13, %28 : vector<16x16xi32>
    %30 = arith.extui %29 : vector<16x16xi1> to vector<16x16xi32>
    %31 = arith.addi %23, %30 : vector<16x16xi32>
    %c10_i32 = arith.constant 10 : i32
    %32 = vector.broadcast %c10_i32 : i32 to vector<16x16xi32>
    %33 = arith.cmpi sge, %12, %32 : vector<16x16xi32>
    %34 = arith.extui %33 : vector<16x16xi1> to vector<16x16xi32>
    %35 = arith.addi %27, %34 : vector<16x16xi32>
    %c10_i32_8 = arith.constant 10 : i32
    %36 = vector.broadcast %c10_i32_8 : i32 to vector<16x16xi32>
    %37 = arith.cmpi sge, %13, %36 : vector<16x16xi32>
    %38 = arith.extui %37 : vector<16x16xi1> to vector<16x16xi32>
    %39 = arith.addi %31, %38 : vector<16x16xi32>
    %c12_i32 = arith.constant 12 : i32
    %40 = vector.broadcast %c12_i32 : i32 to vector<16x16xi32>
    %41 = arith.cmpi sge, %12, %40 : vector<16x16xi32>
    %42 = arith.extui %41 : vector<16x16xi1> to vector<16x16xi32>
    %43 = arith.addi %35, %42 : vector<16x16xi32>
    %c12_i32_9 = arith.constant 12 : i32
    %44 = vector.broadcast %c12_i32_9 : i32 to vector<16x16xi32>
    %45 = arith.cmpi sge, %13, %44 : vector<16x16xi32>
    %46 = arith.extui %45 : vector<16x16xi1> to vector<16x16xi32>
    %47 = arith.addi %39, %46 : vector<16x16xi32>
    %c14_i32 = arith.constant 14 : i32
    %48 = vector.broadcast %c14_i32 : i32 to vector<16x16xi32>
    %49 = arith.cmpi sge, %12, %48 : vector<16x16xi32>
    %50 = arith.extui %49 : vector<16x16xi1> to vector<16x16xi32>
    %51 = arith.addi %43, %50 : vector<16x16xi32>
    %c14_i32_10 = arith.constant 14 : i32
    %52 = vector.broadcast %c14_i32_10 : i32 to vector<16x16xi32>
    %53 = arith.cmpi sge, %13, %52 : vector<16x16xi32>
    %54 = arith.extui %53 : vector<16x16xi1> to vector<16x16xi32>
    %55 = arith.addi %47, %54 : vector<16x16xi32>
    %56 = arith.cmpi eq, %51, %55 : vector<16x16xi32>
    %57 = arith.extui %56 : vector<16x16xi1> to vector<16x16xi32>
    %58 = arith.sitofp %57 : vector<16x16xi32> to vector<16x16xf32>
    %cst = arith.constant 0.000000e+00 : f32
    %cst_11 = arith.constant -1.000000e+30 : f32
    %59 = vector.broadcast %cst : f32 to vector<16x16xf32>
    %60 = vector.broadcast %cst_11 : f32 to vector<16x16xf32>
    %61 = arith.select %56, %59, %60 : vector<16x16xi1>, vector<16x16xf32>
    %cst_12 = arith.constant 0.006737947 : f32
    %62 = vector.broadcast %cst_12 : f32 to vector<8x16xf32>
    %63 = arith.divf %3, %62 : vector<8x16xf32>
    %64 = vector.shape_cast %63 : vector<8x16xf32> to vector<8x1x16xf32>
    %65 = vector.shape_cast %61 : vector<16x16xf32> to vector<1x16x16xf32>
    %66 = vector.broadcast %64 : vector<8x1x16xf32> to vector<8x16x16xf32>
    %67 = vector.broadcast %65 : vector<1x16x16xf32> to vector<8x16x16xf32>
    %68 = arith.addf %66, %67 : vector<8x16x16xf32>
    %cst_13 = arith.constant dense<0xFF800000> : vector<8x16xf32>
    %69 = vector.multi_reduction <maximumf>, %68, %cst_13 [2] : vector<8x16x16xf32> to vector<8x16xf32>
    %70 = arith.subf %63, %69 : vector<8x16xf32>
    %71 = math.exp %70 : vector<8x16xf32>
    %72 = vector.shape_cast %71 : vector<8x16xf32> to vector<8x1x16xf32>
    %73 = vector.shape_cast %58 : vector<16x16xf32> to vector<1x16x16xf32>
    %74 = vector.broadcast %72 : vector<8x1x16xf32> to vector<8x16x16xf32>
    %75 = vector.broadcast %73 : vector<1x16x16xf32> to vector<8x16x16xf32>
    %76 = arith.mulf %74, %75 : vector<8x16x16xf32>
    %cst_14 = arith.constant dense<0.000000e+00> : vector<8x16xf32>
    %77 = vector.multi_reduction <add>, %76, %cst_14 [2] : vector<8x16x16xf32> to vector<8x16xf32>
    %78 = arith.divf %71, %77 : vector<8x16xf32>
    %79 = tpu.iota {dimensions = array<i32: 1>} : vector<8x16xi32>
    %c2_i32_15 = arith.constant 2 : i32
    %80 = vector.broadcast %c2_i32_15 : i32 to vector<8x16xi32>
    %81 = arith.cmpi slt, %79, %80 : vector<8x16xi32>
    %82 = arith.select %81, %3, %78 : vector<8x16xi1>, vector<8x16xf32>
    %cst_16 = arith.constant 4.500000e-01 : f32
    %83 = vector.broadcast %cst_16 : f32 to vector<8x16xf32>
    %84 = arith.subf %82, %83 : vector<8x16xf32>
    %cst_17 = arith.constant 2.000000e+00 : f32
    %85 = vector.broadcast %cst_17 : f32 to vector<8x16xf32>
    %86 = arith.mulf %84, %85 : vector<8x16xf32>
    %cst_18 = arith.constant 5.000000e-01 : f32
    %87 = vector.broadcast %cst_18 : f32 to vector<8x16xf32>
    %88 = arith.subf %86, %87 : vector<8x16xf32>
    %cst_19 = arith.constant 2.000000e+00 : f32
    %89 = vector.broadcast %cst_19 : f32 to vector<8x16xf32>
    %90 = arith.mulf %88, %89 : vector<8x16xf32>
    %91 = arith.truncf %90 : vector<8x16xf32> to vector<8x16xbf16>
    %cst_20 = arith.constant dense<0.000000e+00> : vector<8x64xf32>
    %92 = tpu.matmul %91, %6, %cst_20 {dimension_numbers = #tpu.dot_dimension_numbers<[1], [0], [0], [1], [0, 0, 1, 1], [], []>} : vector<8x16xbf16>, vector<16x64xbf16>, vector<8x64xf32> -> vector<8x64xf32>
    %93 = vector.broadcast %8 : vector<1x64xf32> to vector<8x64xf32>
    %94 = arith.addf %92, %93 : vector<8x64xf32>
    %95 = tpu.iota {dimensions = array<i32: 1>} : vector<1x64xi32>
    %c32_i32 = arith.constant 32 : i32
    %96 = vector.broadcast %c32_i32 : i32 to vector<1x64xi32>
    %97 = arith.cmpi slt, %95, %96 : vector<1x64xi32>
    %98 = arith.extui %97 : vector<1x64xi1> to vector<1x64xi32>
    %99 = arith.sitofp %98 : vector<1x64xi32> to vector<1x64xf32>
    %cst_21 = arith.constant 1.000000e+00 : f32
    %100 = vector.broadcast %cst_21 : f32 to vector<1x64xf32>
    %101 = arith.subf %100, %99 : vector<1x64xf32>
    %102 = vector.broadcast %99 : vector<1x64xf32> to vector<8x64xf32>
    %103 = arith.mulf %94, %102 : vector<8x64xf32>
    %cst_22 = arith.constant dense<0.000000e+00> : vector<8xf32>
    %104 = vector.multi_reduction <add>, %103, %cst_22 [1] : vector<8x64xf32> to vector<8xf32>
    %105 = vector.shape_cast %104 : vector<8xf32> to vector<8x1xf32>
    %106 = vector.broadcast %105 : vector<8x1xf32> to vector<8x64xf32>
    %107 = vector.broadcast %99 : vector<1x64xf32> to vector<8x64xf32>
    %108 = arith.mulf %106, %107 : vector<8x64xf32>
    %109 = vector.broadcast %101 : vector<1x64xf32> to vector<8x64xf32>
    %110 = arith.mulf %94, %109 : vector<8x64xf32>
    %cst_23 = arith.constant dense<0.000000e+00> : vector<8xf32>
    %111 = vector.multi_reduction <add>, %110, %cst_23 [1] : vector<8x64xf32> to vector<8xf32>
    %112 = vector.shape_cast %111 : vector<8xf32> to vector<8x1xf32>
    %113 = vector.broadcast %112 : vector<8x1xf32> to vector<8x64xf32>
    %114 = vector.broadcast %101 : vector<1x64xf32> to vector<8x64xf32>
    %115 = arith.mulf %113, %114 : vector<8x64xf32>
    %116 = arith.addf %108, %115 : vector<8x64xf32>
    %cst_24 = arith.constant 3.125000e-02 : f32
    %117 = vector.broadcast %cst_24 : f32 to vector<8x64xf32>
    %118 = arith.mulf %116, %117 : vector<8x64xf32>
    %119 = arith.subf %94, %118 : vector<8x64xf32>
    %120 = arith.mulf %119, %119 : vector<8x64xf32>
    %121 = vector.broadcast %99 : vector<1x64xf32> to vector<8x64xf32>
    %122 = arith.mulf %120, %121 : vector<8x64xf32>
    %cst_25 = arith.constant dense<0.000000e+00> : vector<8xf32>
    %123 = vector.multi_reduction <add>, %122, %cst_25 [1] : vector<8x64xf32> to vector<8xf32>
    %124 = vector.shape_cast %123 : vector<8xf32> to vector<8x1xf32>
    %125 = vector.broadcast %124 : vector<8x1xf32> to vector<8x64xf32>
    %126 = vector.broadcast %99 : vector<1x64xf32> to vector<8x64xf32>
    %127 = arith.mulf %125, %126 : vector<8x64xf32>
    %128 = vector.broadcast %101 : vector<1x64xf32> to vector<8x64xf32>
    %129 = arith.mulf %120, %128 : vector<8x64xf32>
    %cst_26 = arith.constant dense<0.000000e+00> : vector<8xf32>
    %130 = vector.multi_reduction <add>, %129, %cst_26 [1] : vector<8x64xf32> to vector<8xf32>
    %131 = vector.shape_cast %130 : vector<8xf32> to vector<8x1xf32>
    %132 = vector.broadcast %131 : vector<8x1xf32> to vector<8x64xf32>
    %133 = vector.broadcast %101 : vector<1x64xf32> to vector<8x64xf32>
    %134 = arith.mulf %132, %133 : vector<8x64xf32>
    %135 = arith.addf %127, %134 : vector<8x64xf32>
    %cst_27 = arith.constant 3.125000e-02 : f32
    %136 = vector.broadcast %cst_27 : f32 to vector<8x64xf32>
    %137 = arith.mulf %135, %136 : vector<8x64xf32>
    %cst_28 = arith.constant 9.99999974E-6 : f32
    %138 = vector.broadcast %cst_28 : f32 to vector<8x64xf32>
    %139 = arith.addf %137, %138 : vector<8x64xf32>
    %140 = math.rsqrt %139 : vector<8x64xf32>
    %141 = arith.mulf %119, %140 : vector<8x64xf32>
    %142 = vector.broadcast %9 : vector<1x64xf32> to vector<8x64xf32>
    %143 = arith.mulf %141, %142 : vector<8x64xf32>
    %144 = vector.broadcast %10 : vector<1x64xf32> to vector<8x64xf32>
    %145 = arith.addf %143, %144 : vector<8x64xf32>
    %cst_29 = arith.constant 0.000000e+00 : f32
    %146 = vector.broadcast %cst_29 : f32 to vector<8x64xf32>
    %147 = arith.maximumf %145, %146 : vector<8x64xf32>
    %148 = arith.truncf %147 : vector<8x64xf32> to vector<8x64xbf16>
    %cst_30 = arith.constant dense<0.000000e+00> : vector<8x24xf32>
    %149 = tpu.matmul %148, %7, %cst_30 {dimension_numbers = #tpu.dot_dimension_numbers<[1], [0], [0], [1], [0, 0, 1, 1], [], []>} : vector<8x64xbf16>, vector<64x24xbf16>, vector<8x24xf32> -> vector<8x24xf32>
    %150 = vector.broadcast %11 : vector<1x24xf32> to vector<8x24xf32>
    %151 = arith.addf %149, %150 : vector<8x24xf32>
    %152 = tpu.iota {dimensions = array<i32: 0>} : vector<24x24xi32>
    %153 = tpu.iota {dimensions = array<i32: 1>} : vector<24x24xi32>
    %c0_i32_31 = arith.constant 0 : i32
    %154 = vector.broadcast %c0_i32_31 : i32 to vector<24x24xi32>
    %c0_i32_32 = arith.constant 0 : i32
    %155 = vector.broadcast %c0_i32_32 : i32 to vector<24x24xi32>
    %c4_i32 = arith.constant 4 : i32
    %156 = vector.broadcast %c4_i32 : i32 to vector<24x24xi32>
    %157 = arith.cmpi sge, %152, %156 : vector<24x24xi32>
    %158 = arith.extui %157 : vector<24x24xi1> to vector<24x24xi32>
    %159 = arith.addi %154, %158 : vector<24x24xi32>
    %c4_i32_33 = arith.constant 4 : i32
    %160 = vector.broadcast %c4_i32_33 : i32 to vector<24x24xi32>
    %161 = arith.cmpi sge, %153, %160 : vector<24x24xi32>
    %162 = arith.extui %161 : vector<24x24xi1> to vector<24x24xi32>
    %163 = arith.addi %155, %162 : vector<24x24xi32>
    %c8_i32 = arith.constant 8 : i32
    %164 = vector.broadcast %c8_i32 : i32 to vector<24x24xi32>
    %165 = arith.cmpi sge, %152, %164 : vector<24x24xi32>
    %166 = arith.extui %165 : vector<24x24xi1> to vector<24x24xi32>
    %167 = arith.addi %159, %166 : vector<24x24xi32>
    %c8_i32_34 = arith.constant 8 : i32
    %168 = vector.broadcast %c8_i32_34 : i32 to vector<24x24xi32>
    %169 = arith.cmpi sge, %153, %168 : vector<24x24xi32>
    %170 = arith.extui %169 : vector<24x24xi1> to vector<24x24xi32>
    %171 = arith.addi %163, %170 : vector<24x24xi32>
    %c12_i32_35 = arith.constant 12 : i32
    %172 = vector.broadcast %c12_i32_35 : i32 to vector<24x24xi32>
    %173 = arith.cmpi sge, %152, %172 : vector<24x24xi32>
    %174 = arith.extui %173 : vector<24x24xi1> to vector<24x24xi32>
    %175 = arith.addi %167, %174 : vector<24x24xi32>
    %c12_i32_36 = arith.constant 12 : i32
    %176 = vector.broadcast %c12_i32_36 : i32 to vector<24x24xi32>
    %177 = arith.cmpi sge, %153, %176 : vector<24x24xi32>
    %178 = arith.extui %177 : vector<24x24xi1> to vector<24x24xi32>
    %179 = arith.addi %171, %178 : vector<24x24xi32>
    %c14_i32_37 = arith.constant 14 : i32
    %180 = vector.broadcast %c14_i32_37 : i32 to vector<24x24xi32>
    %181 = arith.cmpi sge, %152, %180 : vector<24x24xi32>
    %182 = arith.extui %181 : vector<24x24xi1> to vector<24x24xi32>
    %183 = arith.addi %175, %182 : vector<24x24xi32>
    %c14_i32_38 = arith.constant 14 : i32
    %184 = vector.broadcast %c14_i32_38 : i32 to vector<24x24xi32>
    %185 = arith.cmpi sge, %153, %184 : vector<24x24xi32>
    %186 = arith.extui %185 : vector<24x24xi1> to vector<24x24xi32>
    %187 = arith.addi %179, %186 : vector<24x24xi32>
    %c16_i32 = arith.constant 16 : i32
    %188 = vector.broadcast %c16_i32 : i32 to vector<24x24xi32>
    %189 = arith.cmpi sge, %152, %188 : vector<24x24xi32>
    %190 = arith.extui %189 : vector<24x24xi1> to vector<24x24xi32>
    %191 = arith.addi %183, %190 : vector<24x24xi32>
    %c16_i32_39 = arith.constant 16 : i32
    %192 = vector.broadcast %c16_i32_39 : i32 to vector<24x24xi32>
    %193 = arith.cmpi sge, %153, %192 : vector<24x24xi32>
    %194 = arith.extui %193 : vector<24x24xi1> to vector<24x24xi32>
    %195 = arith.addi %187, %194 : vector<24x24xi32>
    %c18_i32 = arith.constant 18 : i32
    %196 = vector.broadcast %c18_i32 : i32 to vector<24x24xi32>
    %197 = arith.cmpi sge, %152, %196 : vector<24x24xi32>
    %198 = arith.extui %197 : vector<24x24xi1> to vector<24x24xi32>
    %199 = arith.addi %191, %198 : vector<24x24xi32>
    %c18_i32_40 = arith.constant 18 : i32
    %200 = vector.broadcast %c18_i32_40 : i32 to vector<24x24xi32>
    %201 = arith.cmpi sge, %153, %200 : vector<24x24xi32>
    %202 = arith.extui %201 : vector<24x24xi1> to vector<24x24xi32>
    %203 = arith.addi %195, %202 : vector<24x24xi32>
    %c20_i32 = arith.constant 20 : i32
    %204 = vector.broadcast %c20_i32 : i32 to vector<24x24xi32>
    %205 = arith.cmpi sge, %152, %204 : vector<24x24xi32>
    %206 = arith.extui %205 : vector<24x24xi1> to vector<24x24xi32>
    %207 = arith.addi %199, %206 : vector<24x24xi32>
    %c20_i32_41 = arith.constant 20 : i32
    %208 = vector.broadcast %c20_i32_41 : i32 to vector<24x24xi32>
    %209 = arith.cmpi sge, %153, %208 : vector<24x24xi32>
    %210 = arith.extui %209 : vector<24x24xi1> to vector<24x24xi32>
    %211 = arith.addi %203, %210 : vector<24x24xi32>
    %c22_i32 = arith.constant 22 : i32
    %212 = vector.broadcast %c22_i32 : i32 to vector<24x24xi32>
    %213 = arith.cmpi sge, %152, %212 : vector<24x24xi32>
    %214 = arith.extui %213 : vector<24x24xi1> to vector<24x24xi32>
    %215 = arith.addi %207, %214 : vector<24x24xi32>
    %c22_i32_42 = arith.constant 22 : i32
    %216 = vector.broadcast %c22_i32_42 : i32 to vector<24x24xi32>
    %217 = arith.cmpi sge, %153, %216 : vector<24x24xi32>
    %218 = arith.extui %217 : vector<24x24xi1> to vector<24x24xi32>
    %219 = arith.addi %211, %218 : vector<24x24xi32>
    %220 = arith.cmpi eq, %215, %219 : vector<24x24xi32>
    %221 = arith.extui %220 : vector<24x24xi1> to vector<24x24xi32>
    %222 = arith.sitofp %221 : vector<24x24xi32> to vector<24x24xf32>
    %cst_43 = arith.constant 0.000000e+00 : f32
    %cst_44 = arith.constant -1.000000e+30 : f32
    %223 = vector.broadcast %cst_43 : f32 to vector<24x24xf32>
    %224 = vector.broadcast %cst_44 : f32 to vector<24x24xf32>
    %225 = arith.select %220, %223, %224 : vector<24x24xi1>, vector<24x24xf32>
    %226 = arith.addf %151, %4 : vector<8x24xf32>
    %cst_45 = arith.constant 0.006737947 : f32
    %227 = vector.broadcast %cst_45 : f32 to vector<8x24xf32>
    %228 = arith.divf %226, %227 : vector<8x24xf32>
    %229 = vector.shape_cast %228 : vector<8x24xf32> to vector<8x1x24xf32>
    %230 = vector.shape_cast %225 : vector<24x24xf32> to vector<1x24x24xf32>
    %231 = vector.broadcast %229 : vector<8x1x24xf32> to vector<8x24x24xf32>
    %232 = vector.broadcast %230 : vector<1x24x24xf32> to vector<8x24x24xf32>
    %233 = arith.addf %231, %232 : vector<8x24x24xf32>
    %cst_46 = arith.constant dense<0xFF800000> : vector<8x24xf32>
    %234 = vector.multi_reduction <maximumf>, %233, %cst_46 [2] : vector<8x24x24xf32> to vector<8x24xf32>
    %235 = arith.subf %228, %234 : vector<8x24xf32>
    %236 = math.exp %235 : vector<8x24xf32>
    %237 = vector.shape_cast %236 : vector<8x24xf32> to vector<8x1x24xf32>
    %238 = vector.shape_cast %222 : vector<24x24xf32> to vector<1x24x24xf32>
    %239 = vector.broadcast %237 : vector<8x1x24xf32> to vector<8x24x24xf32>
    %240 = vector.broadcast %238 : vector<1x24x24xf32> to vector<8x24x24xf32>
    %241 = arith.mulf %239, %240 : vector<8x24x24xf32>
    %cst_47 = arith.constant dense<0.000000e+00> : vector<8x24xf32>
    %242 = vector.multi_reduction <add>, %241, %cst_47 [2] : vector<8x24x24xf32> to vector<8x24xf32>
    %243 = tpu.reciprocal %242 {approx = true} : vector<8x24xf32> -> vector<8x24xf32>
    %244 = arith.mulf %236, %243 : vector<8x24xf32>
    %245 = vector.broadcast %5 : vector<8x1xf32> to vector<8x24xf32>
    %246 = arith.mulf %244, %245 : vector<8x24xf32>
    %cst_48 = arith.constant 3.000000e-01 : f32
    %247 = vector.broadcast %cst_48 : f32 to vector<8x24xf32>
    %248 = arith.subf %246, %247 : vector<8x24xf32>
    %cst_49 = arith.constant 3.1622777 : f32
    %249 = vector.broadcast %cst_49 : f32 to vector<8x24xf32>
    %250 = arith.mulf %248, %249 : vector<8x24xf32>
    %c0_50 = arith.constant 0 : index
    %c0_51 = arith.constant 0 : index
    %251 = vector.load %arg3[%c0_50, %c0_51] : memref<8x24xf32, #tpu.memory_space<vmem>>, vector<8x24xf32>
    tpu.vector_store %arg3[%c0_50, %c0_51], %250 {strides = array<i32>} : memref<8x24xf32, #tpu.memory_space<vmem>>, vector<8x24xf32>,
    return
  }
}

</mosaic_0001>

<bundles_post_ra>
// kernel: tpu_custom_call.1
= control target key start
LH: loop header
LB: loop body
LE: loop exit
PB: predicated region body
PF: predicated region fallthrough
CT: control target
= control target key end

     0   :  { %v28_v1 = vlaneseq  ;;  %v1724_v3 = vmov 1966171168   ;;  %v1725_v8 = vmov 0   ;;  %s2335_s0 = inlined_call_operand.vmem [shape: f32[8,128], index: 0, kind: input, shape index: {}]   ;;  %s2336_s1 = inlined_call_operand.vmem [shape: bf16[80,64], index: 1, kind: input, shape index: {}]   ;;  %s2337_s2 = inlined_call_operand.vmem [shape: f32[8,64], index: 2, kind: input, shape index: {}]   ;;  %s2338_s3 = inlined_call_operand.hbm [shape: f32[8,24], index: 3, kind: output, shape index: {}]  }
   0x1   :  { %v1755_v0 = vld [vmem:[%s2335_s0] sm:$0xff]  ;;  %v88_v4 = vunpack.c.l.s4 %v1724_v3 }
   0x2   :  { %v1758_v2 = vmul.f32 148.41316, %v1755_v0  ;;  %v1760_v5 = vshrl.u32 %v28_v1, 7  ;;  %v1762_v6 = vand.u32 127, %v28_v1 }
   0x3   :  { %v89_v7 = vunpack.c.0.s8 %v88_v4 }
   0x4   :  { %vm33_vm0 = vcmp.ge.s32.totalorder %v1760_v5, 1  ;;  %vm37_vm1 = vcmp.ge.s32.totalorder %v1762_v6, 1  ;;  %vm39_vm2 = vcmp.ge.s32.totalorder %v1760_v5, 2  ;;  %vm45_vm3 = vcmp.ge.s32.totalorder %v1762_v6, 2 }
   0x5   :  { %v35_v9 = vsel %vm33_vm0, 1, %v1725_v8  ;;  %v38_v10 = vsel %vm37_vm1, 1, %v1725_v8  ;;  %v41_v11 = vsel %vm39_vm2, 1, %v1725_v8  ;;  %v46_v12 = vsel %vm45_vm3, 1, %v1725_v8 }
   0x6   :  { %v47_v13 = vadd.s32 %v46_v12, %v38_v10  ;;  %vm54_vm4 = vcmp.ge.s32.totalorder %v1762_v6, 10  ;;  %vm63_vm5 = vcmp.ge.s32.totalorder %v1762_v6, 12  ;;  %vm72_vm6 = vcmp.ge.s32.totalorder %v1762_v6, 14 }
   0x7   :  { %v55_v14 = vsel %vm54_vm4, 1, %v1725_v8  ;;  %v64_v15 = vsel %vm63_vm5, 1, %v1725_v8  ;;  %v1778_v16 = vsub.s32 %v89_v7, %v1760_v5 }
   0x8   :  { %8 = vsyncpa [#allocation3], 0  ;;  %v56_v17 = vadd.s32 %v55_v14, %v47_v13  ;;  %v73_v18 = vsel %vm72_vm6, 1, %v1725_v8  ;;  %v1784_v20 = vsub.s32 0, %v1760_v5  ;;  %vm784_vm7 = vcmp.ge.s32.totalorder %v1762_v6, 4  ;;  %s1729_s25 = smov 112  }
   0x9   :  { %v93_v19 = vrot.slane %v1758_v2, %v1778_v16  ;;  %vm795_vm8 = vcmp.ge.s32.totalorder %v1762_v6, 8  ;;  %v1788_v21 = vadd.s32 %v41_v11, %v35_v9  ;;  %v785_v23 = vsel %vm784_vm7, 1, %v1725_v8 }
   0xa   :  { %v65_v22 = vadd.s32 %v64_v15, %v56_v17  ;;  %v796_v24 = vsel %vm795_vm8, 1, %v1725_v8  ;;  %vm191_vm9 = vcmask 130048   ;;  %v30_v29 = vadd.s32 8, %v1760_v5 }
   0xb   :  { %v109_v25 = vrot.slane %v93_v19, %v1778_v16  ;;  %v797_v26 = vadd.s32 %v796_v24, %v785_v23  ;;  %v101_v28 = vcombine.high %v93_v19, %v93_v19  ;;  %v86_v33 = vcombine.high %v1758_v2, %v1758_v2 }
   0xc   :  { %v1793_v27 = vadd.s32 %v73_v18, %v65_v22  ;;  %vm49_vm11 = vcmp.ge.s32.totalorder %v30_v29, 10  ;;  %vm58_vm12 = vcmp.ge.s32.totalorder %v30_v29, 12  ;;  %v1726_v35 = vmov -1e+30  }
   0xd   :  { %v138_v30 = vrot.slane %v109_v25, %v1784_v20  ;;  %v803_v31 = vadd.s32 %v797_v26, %v64_v15  ;;  %v131_v32 = vcombine.high %v109_v25, %v109_v25  ;;  %v123_v34 = vrot.slane %v101_v28, %v1778_v16 }
   0xe   :  { %vm75_vm10 = vcmp.eq.s32.totalorder %v1788_v21, %v1793_v27  ;;  %v51_v38 = vsel %vm49_vm11, 1, %v1725_v8  ;;  %v1812_v39 = vsel %vm58_vm12, 1, %v1725_v8  ;;  %vm67_vm13 = vcmp.ge.s32.totalorder %v30_v29, 14 }
   0xf   :  { %v1806_v36 = vsel %vm75_vm10, 0.0, %v1726_v35  ;;  %v1808_v37 = vadd.s32 %v803_v31, %v73_v18  ;;  %v142_v41 = vrot.slane %v123_v34, %v1784_v20  ;;  %v53_v42 = vadd.s32 2, %v51_v38 }
  0x10   :  { %v175_v40 = vadd.f32 %v138_v30, %v1806_v36  ;;  %v1817_v43 = vsel %vm67_vm13, 1, %v1725_v8  ;;  %v100_v44 = vrot.slane %v86_v33, %v1778_v16  ;;  %v146_v48 = vrot.slane %v131_v32, %v1784_v20 }
  0x11   :  { %v177_v46 = vadd.f32 %v142_v41, %v1806_v36  ;;  %v62_v47 = vadd.s32 %v1812_v39, %v53_v42  ;;  %v133_v63 = vcombine.high %v123_v34, %v123_v34  ;;  %vm265_vm15 = vcmask 130112  }
  0x12   :  { %v192_v45 = vsel %vm191_vm9, %v175_v40, -inf  ;;  %v116_v49 = vrot.slane %v100_v44, %v1778_v16  ;;  %v102_v52 = vcombine.high %v100_v44, %v100_v44  ;;  %v179_v54 = vadd.f32 %v146_v48, %v1806_v36 }
  0x13   :  { %193 = vmax.xlane.f32.xlu0 %v192_v45  ;;  %v198_v50 = vsel %vm191_vm9, %v177_v46, -inf  ;;  %v1827_v51 = vadd.s32 %v1817_v43, %v62_v47  ;;  %v150_v9 = vrot.slane %v133_v63, %v1784_v20  ;;  %v1727_v40 = vmov 0.0  }
  0x14   :  { %199 = vmax.xlane.f32.xlu1 %v198_v50  ;;  %v154_v55 = vrot.slane %v116_v49, %v1784_v20  ;;  %v130_v59 = vrot.slane %v102_v52, %v1778_v16  ;;  %v204_v62 = vsel %vm191_vm9, %v179_v54, -inf  ;;  %v132_v10 = vcombine.high %v116_v49, %v116_v49  ;;  %1612 = vmatprep.subr.bf16.mxu0 %v1727_v40 }
  0x15   :  { %vm76_vm14 = vcmp.eq.s32.totalorder %v1827_v51, %v1793_v27  ;;  %v181_v17 = vadd.f32 %v150_v9, %v1806_v36  ;;  %1618 = vmatprep.subr.bf16.mxu1 %v1727_v40  ;;  %v260_v46 = vadd.s32 4294967288, %v1762_v6  ;;  %v1869_v52 = vsub.s32 %v1762_v6, %v1760_v5 }
  0x16   :  { %v82_v53 = vsel %vm76_vm14, 0.0, %v1726_v35  ;;  %v183_v4 = vadd.f32 %v154_v55, %v1806_v36  ;;  %v158_v7 = vrot.slane %v130_v59, %v1784_v20  ;;  %v162_v22 = vrot.slane %v132_v10, %v1784_v20 }
  0x17   :  { %v176_v56 = vadd.f32 %v138_v30, %v82_v53  ;;  %v178_v57 = vadd.f32 %v142_v41, %v82_v53  ;;  %v180_v58 = vadd.f32 %v146_v48, %v82_v53  ;;  %v184_v3 = vadd.f32 %v154_v55, %v82_v53 }
  0x18   :  { %v216_v12 = vsel %vm191_vm9, %v183_v4, -inf  ;;  %v186_v13 = vadd.f32 %v158_v7, %v82_v53  ;;  %v185_v14 = vadd.f32 %v158_v7, %v1806_v36  ;;  %v182_v15 = vadd.f32 %v150_v9, %v82_v53 }
  0x19   :  { %v195_v60 = vsel %vm191_vm9, %v176_v56, -inf  ;;  %v201_v61 = vsel %vm191_vm9, %v178_v57, -inf  ;;  %v207_v1 = vsel %vm191_vm9, %v180_v58, -inf  ;;  %v219_v11 = vsel %vm191_vm9, %v184_v3, -inf }
  0x1a   :  { %196 = vmax.xlane.f32.xlu0 %v195_v60  ;;  %202 = vmax.xlane.f32.xlu1 %v201_v61  ;;  %v225_v18 = vsel %vm191_vm9, %v186_v13, -inf  ;;  %v222_v19 = vsel %vm191_vm9, %v185_v14, -inf  ;;  %v134_v23 = vcombine.high %v130_v59, %v130_v59  ;;  %v213_v24 = vsel %vm191_vm9, %v182_v15, -inf }
  0x1b   :  { %v210_v25 = vsel %vm191_vm9, %v181_v17, -inf  ;;  %v188_v26 = vadd.f32 %v162_v22, %v82_v53  ;;  %v187_v28 = vadd.f32 %v162_v22, %v1806_v36  ;;  %v1865_v48 = vsub.s32 %v260_v46, %v1760_v5 }
  0x1c   :  { %v166_v29 = vrot.slane %v134_v23, %v1784_v20  ;;  %vm330_vm0 = vcmask 1041409   ;;  %vm332_vm1 = vcmask 1042434   ;;  %vm334_vm2 = vcmask 1043459  }
  0x1d   :  { %v231_v30 = vsel %vm191_vm9, %v188_v26, -inf  ;;  %v228_v31 = vsel %vm191_vm9, %v187_v28, -inf  ;;  %vm336_vm3 = vcmask 1044484   ;;  %vm338_vm4 = vcmask 1045509  }
  0x1e   :  { %205 = vmax.xlane.f32.xlu0 %v204_v62  ;;  %208 = vmax.xlane.f32.xlu1 %v207_v1  ;;  %v190_v32 = vadd.f32 %v166_v29, %v82_v53  ;;  %v189_v33 = vadd.f32 %v166_v29, %v1806_v36  ;;  %vm340_vm5 = vcmask 1046534   ;;  %vm342_vm6 = vcmask 1047559  }
  0x1f   :  { %vm1728_vm7 = vmmov 0   ;;  %vm600_vm8 = vcmp.lt.s32.totalorder %v1762_v6, 2  ;;  %vm665_vm11 = vcmask 523264   ;;  %vm831_vm12 = vcmp.ge.s32.totalorder %v1762_v6, 18 }
  0x20   :  { %v237_v34 = vsel %vm191_vm9, %v190_v32, -inf  ;;  %v234_v38 = vsel %vm191_vm9, %v189_v33, -inf  ;;  %1614 = vmatprep.mubr.msk.bf16.mxu0 %vm1728_vm7, %v1727_v40  ;;  %1626 = vmatprep.mubr.msk.bf16.mxu1 %vm1728_vm7, %v1727_v40  ;;  %vm843_vm13 = vcmp.ge.s32.totalorder %v1762_v6, 20  ;;  %vm855_vm7 = vcmp.ge.s32.totalorder %v1762_v6, 22 }
  0x22   :  { %220 = vmax.xlane.f32.xlu1 %v219_v11  ;;  %217 = vmax.xlane.f32.xlu0 %v216_v12 }
  0x26   :  { %226 = vmax.xlane.f32.xlu1 %v225_v18  ;;  %223 = vmax.xlane.f32.xlu0 %v222_v19 }
  0x2a   :  { %214 = vmax.xlane.f32.xlu1 %v213_v24  ;;  %211 = vmax.xlane.f32.xlu0 %v210_v25 }
  0x2e   :  { %232 = vmax.xlane.f32.xlu1 %v231_v30  ;;  %229 = vmax.xlane.f32.xlu0 %v228_v31 }
  0x32   :  { %238 = vmax.xlane.f32.xlu1 %v237_v34  ;;  %235 = vmax.xlane.f32.xlu0 %v234_v38 }
  0x9c   :  { %v194_v41 = vpop.xlane.xlu0 %193 }
  0x9d   :  { %v200_v42 = vpop.xlane.xlu1 %199  ;;  %v259_v59 = vrot.slane %v194_v41, %v1869_v52 }
  0x9e   :  { %v270_v60 = vrot.slane %v200_v42, %v1869_v52 }
  0xa3   :  { %v197_v44 = vpop.xlane.xlu0 %196  ;;  %v203_v45 = vpop.xlane.xlu1 %202 }
  0xa4   :  { %v264_v53 = vrot.slane %v197_v44, %v1865_v48  ;;  %v274_v54 = vrot.slane %v203_v45, %v1865_v48 }
  0xa6   :  { %v266_v61 = vsel %vm265_vm15, %v264_v53, %v259_v59  ;;  %v275_v62 = vsel %vm265_vm15, %v274_v54, %v270_v60 }
  0xa7   :  { %v206_v36 = vpop.xlane.xlu0 %205  ;;  %v209_v47 = vpop.xlane.xlu1 %208  ;;  %v331_v11 = vsel %vm330_vm0, %v275_v62, %v266_v61 }
  0xa8   :  { %v279_v55 = vrot.slane %v206_v36, %v1869_v52  ;;  %v283_v56 = vrot.slane %v209_v47, %v1865_v48 }
  0xaa   :  { %v284_v63 = vsel %vm265_vm15, %v283_v56, %v279_v55 }
  0xab   :  { %v221_v49 = vpop.xlane.xlu1 %220  ;;  %v218_v50 = vpop.xlane.xlu0 %217  ;;  %v333_v12 = vsel %vm332_vm1, %v284_v63, %v331_v11 }
  0xac   :  { %v301_v1 = vrot.slane %v221_v49, %v1865_v48  ;;  %v297_v3 = vrot.slane %v218_v50, %v1869_v52  ;;  %v1590_v50 = vsel %vm76_vm14, 1.0, %v1727_v40 }
  0xae   :  { %v302_v17 = vsel %vm265_vm15, %v301_v1, %v297_v3 }
  0xaf   :  { %v227_v57 = vpop.xlane.xlu1 %226  ;;  %v224_v58 = vpop.xlane.xlu0 %223 }
  0xb0   :  { %v310_v13 = vrot.slane %v227_v57, %v1865_v48  ;;  %v306_v14 = vrot.slane %v224_v58, %v1869_v52 }
  0xb2   :  { %v311_v26 = vsel %vm265_vm15, %v310_v13, %v306_v14 }
  0xb3   :  { %v215_v4 = vpop.xlane.xlu1 %214  ;;  %v212_v7 = vpop.xlane.xlu0 %211 }
  0xb4   :  { %v292_v9 = vrot.slane %v215_v4, %v1865_v48  ;;  %v288_v10 = vrot.slane %v212_v7, %v1869_v52 }
  0xb6   :  { %v293_v15 = vsel %vm265_vm15, %v292_v9, %v288_v10 }
  0xb7   :  { %v335_v18 = vsel %vm334_vm2, %v293_v15, %v333_v12  ;;  %v233_v19 = vpop.xlane.xlu1 %232  ;;  %v230_v22 = vpop.xlane.xlu0 %229 }
  0xb8   :  { %v337_v23 = vsel %vm336_vm3, %v302_v17, %v335_v18  ;;  %v319_v24 = vrot.slane %v233_v19, %v1865_v48  ;;  %v315_v25 = vrot.slane %v230_v22, %v1869_v52 }
  0xb9   :  { %v339_v28 = vsel %vm338_vm4, %v311_v26, %v337_v23 }
  0xba   :  { %v320_v29 = vsel %vm265_vm15, %v319_v24, %v315_v25 }
  0xbb   :  { %v239_v30 = vpop.xlane.xlu1 %238  ;;  %v236_v31 = vpop.xlane.xlu0 %235  ;;  %v341_v34 = vsel %vm340_vm5, %v320_v29, %v339_v28 }
  0xbc   :  { %v328_v32 = vrot.slane %v239_v30, %v1865_v48  ;;  %v324_v33 = vrot.slane %v236_v31, %v1869_v52 }
  0xbe   :  { %v329_v38 = vsel %vm265_vm15, %v328_v32, %v324_v33 }
  0xbf   :  { %v343_v41 = vsel %vm342_vm6, %v329_v38, %v341_v34 }
  0xc0   :  { %v345_v42 = vsub.f32 %v1758_v2, %v343_v41  ;;  %v1589_v2 = vsel %vm75_vm10, 1.0, %v1727_v40  ;;  %vm660_vm10 = vcmp.lt.s32.totalorder %v1762_v6, 32 }
  0xc2   :  { %v346_v44 = vmul.f32 1.442695, %v345_v42 }
  0xc4   :  { %1645 = vpow2.f32 %v346_v44 }
  0xd1   :  { %v1903_v45 = vpop.eup %1645 }
  0xd2   :  { %v356_v46 = vrot.slane %v1903_v45, %v1778_v16  ;;  %v349_v36 = vcombine.high %v1903_v45, %v1903_v45 }
  0xd4   :  { %v372_v47 = vrot.slane %v356_v46, %v1778_v16  ;;  %v364_v49 = vcombine.high %v356_v46, %v356_v46  ;;  %v363_v53 = vrot.slane %v349_v36, %v1778_v16 }
  0xd6   :  { %v401_v54 = vrot.slane %v372_v47, %v1784_v20  ;;  %v386_v55 = vrot.slane %v364_v49, %v1778_v16  ;;  %v394_v56 = vcombine.high %v372_v47, %v372_v47  ;;  %v379_v51 = vrot.slane %v363_v53, %v1778_v16 }
  0xd7   :  { %v365_v3 = vcombine.high %v363_v53, %v363_v53 }
  0xd8   :  { %v439_v57 = vmul.f32 %v1590_v50, %v401_v54  ;;  %v438_v58 = vmul.f32 %v1589_v2, %v401_v54  ;;  %v405_v59 = vrot.slane %v386_v55, %v1784_v20  ;;  %v409_v60 = vrot.slane %v394_v56, %v1784_v20  ;;  %v1640_v54 = vld [vmem:[%s2336_s1] sm:$0xff]  }
  0xd9   :  { %v417_v63 = vrot.slane %v379_v51, %v1784_v20  ;;  %v396_v1 = vcombine.high %v386_v55, %v386_v55  ;;  %v393_v12 = vrot.slane %v365_v3, %v1778_v16  ;;  %v395_v19 = vcombine.high %v379_v51, %v379_v51  ;;  %1613 = vmatpush3.bf16.msra.mxu0 %v1640_v54 }
  0xda   :  { %v457_v61 = vsel %vm191_vm9, %v439_v57, 0.0  ;;  %v454_v21 = vsel %vm191_vm9, %v438_v58, 0.0  ;;  %v441_v27 = vmul.f32 %v1590_v50, %v405_v59  ;;  %v440_v62 = vmul.f32 %v1589_v2, %v405_v59 }
  0xdb   :  { %458 = vadd.xlane.f32.xlu1 %v457_v61  ;;  %455 = vadd.xlane.f32.xlu0 %v454_v21  ;;  %v443_v9 = vmul.f32 %v1590_v50, %v409_v60  ;;  %v442_v10 = vmul.f32 %v1589_v2, %v409_v60  ;;  %v447_v11 = vmul.f32 %v1590_v50, %v417_v63 }
  0xdc   :  { %v463_v4 = vsel %vm191_vm9, %v441_v27, 0.0  ;;  %v460_v7 = vsel %vm191_vm9, %v440_v62, 0.0  ;;  %v446_v15 = vmul.f32 %v1589_v2, %v417_v63  ;;  %v413_v17 = vrot.slane %v396_v1, %v1784_v20 }
  0xdd   :  { %v469_v13 = vsel %vm191_vm9, %v443_v9, 0.0  ;;  %v466_v14 = vsel %vm191_vm9, %v442_v10, 0.0  ;;  %v421_v18 = vrot.slane %v393_v12, %v1784_v20  ;;  %v481_v22 = vsel %vm191_vm9, %v447_v11, 0.0 }
  0xde   :  { %v478_v23 = vsel %vm191_vm9, %v446_v15, 0.0  ;;  %v445_v24 = vmul.f32 %v1590_v50, %v413_v17  ;;  %v444_v25 = vmul.f32 %v1589_v2, %v413_v17  ;;  %v425_v28 = vrot.slane %v395_v19, %v1784_v20 }
  0xdf   :  { %464 = vadd.xlane.f32.xlu1 %v463_v4  ;;  %461 = vadd.xlane.f32.xlu0 %v460_v7  ;;  %v449_v26 = vmul.f32 %v1590_v50, %v421_v18  ;;  %v448_v31 = vmul.f32 %v1589_v2, %v421_v18  ;;  %v397_v32 = vcombine.high %v393_v12, %v393_v12 }
  0xe0   :  { %v475_v29 = vsel %vm191_vm9, %v445_v24, 0.0  ;;  %v472_v30 = vsel %vm191_vm9, %v444_v25, 0.0  ;;  %v451_v33 = vmul.f32 %v1590_v50, %v425_v28  ;;  %v450_v41 = vmul.f32 %v1589_v2, %v425_v28 }
  0xe1   :  { %v487_v34 = vsel %vm191_vm9, %v449_v26, 0.0  ;;  %v484_v38 = vsel %vm191_vm9, %v448_v31, 0.0  ;;  %v429_v42 = vrot.slane %v397_v32, %v1784_v20 }
  0xe2   :  { %v493_v44 = vsel %vm191_vm9, %v451_v33, 0.0  ;;  %v490_v46 = vsel %vm191_vm9, %v450_v41, 0.0 }
  0xe3   :  { %470 = vadd.xlane.f32.xlu1 %v469_v13  ;;  %467 = vadd.xlane.f32.xlu0 %v466_v14  ;;  %v453_v36 = vmul.f32 %v1590_v50, %v429_v42  ;;  %v452_v47 = vmul.f32 %v1589_v2, %v429_v42 }
  0xe5   :  { %v499_v49 = vsel %vm191_vm9, %v453_v36, 0.0  ;;  %v496_v53 = vsel %vm191_vm9, %v452_v47, 0.0 }
  0xe7   :  { %482 = vadd.xlane.f32.xlu1 %v481_v22  ;;  %479 = vadd.xlane.f32.xlu0 %v478_v23 }
  0xeb   :  { %476 = vadd.xlane.f32.xlu1 %v475_v29  ;;  %473 = vadd.xlane.f32.xlu0 %v472_v30 }
  0xef   :  { %488 = vadd.xlane.f32.xlu1 %v487_v34  ;;  %485 = vadd.xlane.f32.xlu0 %v484_v38 }
  0xf3   :  { %494 = vadd.xlane.f32.xlu1 %v493_v44  ;;  %491 = vadd.xlane.f32.xlu0 %v490_v46 }
  0xf7   :  { %500 = vadd.xlane.f32.xlu1 %v499_v49  ;;  %497 = vadd.xlane.f32.xlu0 %v496_v53 }
 0x164   :  { %v459_v50 = vpop.xlane.xlu1 %458  ;;  %v456_v2 = vpop.xlane.xlu0 %455 }
 0x165   :  { %v525_v1 = vrot.slane %v459_v50, %v1865_v48  ;;  %v521_v3 = vrot.slane %v456_v2, %v1869_v52 }
 0x167   :  { %v526_v13 = vsel %vm265_vm15, %v525_v1, %v521_v3 }
 0x168   :  { %v465_v55 = vpop.xlane.xlu1 %464  ;;  %v462_v56 = vpop.xlane.xlu0 %461 }
 0x169   :  { %v534_v21 = vrot.slane %v465_v55, %v1865_v48  ;;  %v530_v27 = vrot.slane %v462_v56, %v1869_v52 }
 0x16b   :  { %v535_v11 = vsel %vm265_vm15, %v534_v21, %v530_v27 }
 0x16c   :  { %v471_v57 = vpop.xlane.xlu1 %470  ;;  %v468_v58 = vpop.xlane.xlu0 %467  ;;  %v590_v18 = vsel %vm330_vm0, %v535_v11, %v526_v13 }
 0x16d   :  { %v543_v62 = vrot.slane %v471_v57, %v1865_v48  ;;  %v539_v63 = vrot.slane %v468_v58, %v1869_v52  ;;  %v1990_v58 = vld [vmem:[%s2337_s2] sm:$0xff] }
 0x16f   :  { %v544_v12 = vsel %vm265_vm15, %v543_v62, %v539_v63 }
 0x170   :  { %v483_v59 = vpop.xlane.xlu1 %482  ;;  %v480_v60 = vpop.xlane.xlu0 %479  ;;  %v591_v25 = vsel %vm332_vm1, %v544_v12, %v590_v18 }
 0x171   :  { %v561_v19 = vrot.slane %v483_v59, %v1865_v48  ;;  %v557_v22 = vrot.slane %v480_v60, %v1869_v52  ;;  %v1595_v59 = vsel %vm660_vm10, 1.0, %v1727_v40  ;;  %vm778_vm10 = vcmp.ge.s32.totalorder %v1760_v5, 4 }
 0x172   :  { %v663_v60 = vsub.f32 1.0, %v1595_v59 }
 0x173   :  { %v562_v31 = vsel %vm265_vm15, %v561_v19, %v557_v22 }
 0x174   :  { %v477_v51 = vpop.xlane.xlu1 %476  ;;  %v474_v61 = vpop.xlane.xlu0 %473 }
 0x175   :  { %v552_v4 = vrot.slane %v477_v51, %v1865_v48  ;;  %v548_v7 = vrot.slane %v474_v61, %v1869_v52 }
 0x177   :  { %v553_v14 = vsel %vm265_vm15, %v552_v4, %v548_v7 }
 0x178   :  { %v489_v9 = vpop.xlane.xlu1 %488  ;;  %v486_v10 = vpop.xlane.xlu0 %485  ;;  %v592_v29 = vsel %vm334_vm2, %v553_v14, %v591_v25  ;;  %v1643_v25 = vld [vmem:[%s2336_s1 + $0x10] sm:$0xff]  }
 0x179   :  { %v570_v15 = vrot.slane %v489_v9, %v1865_v48  ;;  %v566_v17 = vrot.slane %v486_v10, %v1869_v52  ;;  %v593_v38 = vsel %vm336_vm3, %v562_v31, %v592_v29 }
 0x17b   :  { %v571_v30 = vsel %vm265_vm15, %v570_v15, %v566_v17 }
 0x17c   :  { %v495_v23 = vpop.xlane.xlu1 %494  ;;  %v492_v24 = vpop.xlane.xlu0 %491  ;;  %v594_v44 = vsel %vm338_vm4, %v571_v30, %v593_v38  ;;  %v696_v38 = vsub.s32 1, %v1760_v5 }
 0x17d   :  { %v579_v26 = vrot.slane %v495_v23, %v1865_v48  ;;  %v575_v28 = vrot.slane %v492_v24, %v1869_v52  ;;  %v1641_v23 = vld [vmem:[%s2336_s1 + $0x20] sm:$0xff]   ;;  %v1642_v24 = vld [vmem:[%s2336_s1 + $0x18] sm:$0xff]  }
 0x17e   :  { %1619 = vmatpush3.bf16.msra.mxu1 %v1641_v23 }
 0x17f   :  { %v580_v32 = vsel %vm265_vm15, %v579_v26, %v575_v28  ;;  %1620 = vmatprep.subr.bf16.mxu1 %v1727_v40  ;;  %v1644_v26 = vld [vmem:[%s2336_s1 + $0x8] sm:$0xff]  }
 0x180   :  { %v501_v33 = vpop.xlane.xlu1 %500  ;;  %v498_v34 = vpop.xlane.xlu0 %497  ;;  %v595_v46 = vsel %vm340_vm5, %v580_v32, %v594_v44 }
 0x181   :  { %v588_v41 = vrot.slane %v501_v33, %v1865_v48  ;;  %v584_v42 = vrot.slane %v498_v34, %v1869_v52 }
 0x182   :  { %1621 = vmatpush3.bf16.msra.mxu1 %v1642_v24 }
 0x183   :  { %v589_v36 = vsel %vm265_vm15, %v588_v41, %v584_v42  ;;  %1622 = vmatprep.subr.bf16.mxu1 %v1727_v40  ;;  %v701_v41 = vsub.s32 2, %v1760_v5  ;;  %v697_v42 = vrot.slane %v1990_v58, %v696_v38 }
 0x184   :  { %v596_v47 = vsel %vm342_vm6, %v589_v36, %v595_v46 }
 0x185   :  { %1647 = vrcp.f32 %v596_v47  ;;  %v702_v36 = vrot.slane %v1990_v58, %v701_v41 }
 0x186   :  { %1623 = vmatpush3.bf16.msra.mxu1 %v1643_v25 }
 0x187   :  { %1624 = vmatprep.subr.bf16.mxu1 %v1727_v40 }
 0x18a   :  { %1625 = vmatpush3.bf16.msra.mxu1 %v1644_v26 }
 0x192   :  { %v1648_v49 = vpop.eup %1647 }
 0x193   :  { %v599_v53 = vmul.f32 %v1648_v49, %v1903_v45  ;;  %v610_v45 = vrot.slane %v1990_v58, %v1784_v20 }
 0x195   :  { %v601_v54 = vsel %vm600_vm8, %v1755_v0, %v599_v53 }
 0x196   :  { %v1591_v50 = vadd.f32 -0.45, %v601_v54 }
 0x198   :  { %v603_v2 = vmul.f32 2.0, %v1591_v50  ;;  %v777_v50 = vadd.s32 16, %v1760_v5 }
 0x19a   :  { %v1592_v55 = vadd.f32 -0.5, %v603_v2  ;;  %vm824_vm14 = vcmp.ge.s32.totalorder %v777_v50, 18  ;;  %vm836_vm8 = vcmp.ge.s32.totalorder %v777_v50, 20 }
 0x19c   :  { %v605_v56 = vmul.f32 2.0, %v1592_v55  ;;  %v832_v55 = vsel %vm831_vm12, 1, %v1725_v8 }
 0x19e   :  { %v606_v57 = vpack.c.bf16 %v605_v56, %v605_v56  ;;  %v708_v56 = vsub.s32 3, %v1760_v5 }
 0x1a0   :  { %1615 = vmatmul.mubr.msk.bf16.vlgmr.msra.gmra.mxu0 %vm191_vm9, %v606_v57  ;;  %vm819_vm9 = vcmp.ge.s32.totalorder %v1762_v6, 16 }
 0x1a1   :  { %v820_v54 = vsel %vm819_vm9, 1, %v1725_v8 }
 0x1a2   :  { %v821_v2 = vadd.s32 %v820_v54, %v1808_v37 }
 0x1a4   :  { %v833_v57 = vadd.s32 %v832_v55, %v821_v2 }
 0x260   :  { %v654_v51 = vpop.f32.mrf.mxu0 }
 0x261   :  { %v655_v61 = vadd.f32 %v654_v51, %v610_v45  ;;  %v709_v45 = vrot.slane %v1990_v58, %v708_v56 }
 0x262   :  { %v1616_v21 = vpop.f32.mrf.mxu0 }
 0x263   :  { %v670_v27 = vmul.f32 %v663_v60, %v655_v61  ;;  %v664_v62 = vmul.f32 %v1595_v59, %v655_v61  ;;  %v856_v21 = vsel %vm855_vm7, 1, %v1725_v8  ;;  %vm1101_vm7 = vcmask 195712  }
 0x264   :  { %v657_v63 = vpop.f32.mrf.mxu0 }
 0x265   :  { %v671_v1 = vsel %vm665_vm11, %v670_v27, 0.0  ;;  %v666_v3 = vsel %vm665_vm11, %v664_v62, 0.0  ;;  %v801_v63 = vadd.s32 2, %v1812_v39 }
 0x266   :  { %672 = vadd.xlane.f32.xlu1 %v671_v1  ;;  %667 = vadd.xlane.f32.xlu0 %v666_v3  ;;  %v1617_v4 = vpop.f32.mrf.mxu0  ;;  %v839_v1 = vsel %vm836_vm8, 1, %v1725_v8 }
 0x2ef   :  { %v673_v7 = vpop.xlane.xlu1 %672  ;;  %v668_v9 = vpop.xlane.xlu0 %667 }
 0x2f0   :  { %v674_v10 = vmul.f32 %v673_v7, %v663_v60  ;;  %v669_v11 = vmul.f32 %v1595_v59, %v668_v9  ;;  %v2039_v9 = vsel %vm778_vm10, 1, %v1725_v8 }
 0x2f2   :  { %v675_v12 = vadd.f32 %v674_v10, %v669_v11 }
 0x2f4   :  { %v676_v13 = vmul.f32 0.03125, %v675_v12  ;;  %v2044_v12 = vadd.s32 %v801_v63, %v1817_v43 }
 0x2f6   :  { %v677_v14 = vsub.f32 %v655_v61, %v676_v13 }
 0x2f8   :  { %v678_v15 = vmul.f32 %v677_v14, %v677_v14 }
 0x2fa   :  { %v684_v17 = vmul.f32 %v678_v15, %v663_v60  ;;  %v679_v18 = vmul.f32 %v1595_v59, %v678_v15 }
 0x2fc   :  { %v685_v19 = vsel %vm665_vm11, %v684_v17, 0.0  ;;  %v680_v22 = vsel %vm665_vm11, %v679_v18, 0.0 }
 0x2fd   :  { %686 = vadd.xlane.f32.xlu1 %v685_v19  ;;  %681 = vadd.xlane.f32.xlu0 %v680_v22 }
 0x313   :  { %871 = vrot.lane.b32.xlu0 %v1755_v0, %s1729_s25 }
 0x386   :  { %v687_v28 = vpop.xlane.xlu1 %686  ;;  %v682_v29 = vpop.xlane.xlu0 %681 }
 0x387   :  { %v688_v30 = vmul.f32 %v687_v28, %v663_v60  ;;  %v683_v31 = vmul.f32 %v1595_v59, %v682_v29  ;;  %v844_v59 = vsel %vm843_vm13, 1, %v1725_v8  ;;  %v827_v60 = vsel %vm824_vm14, 1, %v1725_v8 }
 0x388   :  { %v845_v51 = vadd.s32 %v844_v59, %v833_v57  ;;  %v830_v27 = vadd.s32 5, %v827_v60  ;;  %vm990_vm13 = vcmask 195584  }
 0x389   :  { %v689_v32 = vadd.f32 %v688_v30, %v683_v31 }
 0x38a   :  { %v872_v37 = vpop.permute.xlu0 %871  ;;  %v2036_v4 = vadd.s32 %v856_v21, %v845_v51  ;;  %v842_v10 = vadd.s32 %v839_v1, %v830_v27 }
 0x38b   :  { %v690_v33 = vmul.f32 0.03125, %v689_v32 }
 0x38c   :  { %vm858_vm9 = vcmp.eq.s32.totalorder %v2039_v9, %v2036_v4  ;;  %vm859_vm12 = vcmp.eq.s32.totalorder %v2044_v12, %v2036_v4 }
 0x38d   :  { %v691_v34 = vadd.f32 1e-05, %v690_v33  ;;  %v2063_v43 = vsel %vm858_vm9, 0.0, %v1726_v35  ;;  %v2070_v25 = vsel %vm859_vm12, 0.0, %v1726_v35 }
 0x38f   :  { %1649 = vrsqrt.f32 %v691_v34 }
 0x39c   :  { %v1650_v44 = vpop.eup %1649 }
 0x39d   :  { %v693_v46 = vmul.f32 %v1650_v44, %v677_v14 }
 0x39f   :  { %v698_v47 = vmul.f32 %v697_v42, %v693_v46 }
 0x3a1   :  { %v703_v0 = vadd.f32 %v702_v36, %v698_v47 }
 0x3a3   :  { %v704_v49 = vmax.f32 %v703_v0, 0.0 }
 0x3a5   :  { %v705_v53 = vpack.c.bf16 %v704_v49, %v704_v49 }
 0x3a7   :  { %1627 = vmatmul.mubr.msk.bf16.vlgmr.msra.gmra.mxu1 %vm665_vm11, %v705_v53  ;;  %vm848_vm11 = vcmp.ge.s32.totalorder %v777_v50, 22 }
 0x3a8   :  { %v851_v13 = vsel %vm848_vm11, 1, %v1725_v8 }
 0x3a9   :  { %v2053_v17 = vadd.s32 %v851_v13, %v842_v10 }
 0x3ab   :  { %vm860_vm14 = vcmp.eq.s32.totalorder %v2053_v17, %v2036_v4 }
 0x3ac   :  { %v2089_v41 = vsel %vm860_vm14, 0.0, %v1726_v35  ;;  %v2220_v12 = vsel %vm860_vm14, 1.0, %v1727_v40 }
 0x467   :  { %v771_v61 = vpop.f32.mrf.mxu1 }
 0x468   :  { %v772_v62 = vadd.f32 %v771_v61, %v709_v45 }
 0x469   :  { %v1628_v3 = vpop.f32.mrf.mxu1 }
 0x46a   :  { %v874_v58 = vadd.f32 %v872_v37, %v772_v62 }
 0x46b   :  { %v774_v7 = vpop.f32.mrf.mxu1 }
 0x46c   :  { %v2041_v11 = vmul.f32 148.41316, %v874_v58 }
 0x46d   :  { %v1629_v39 = vpop.f32.mrf.mxu1 }
 0x46e   :  { %v877_v14 = vcombine.high %v2041_v11, %v2041_v11  ;;  %v884_v15 = vrot.slane %v2041_v11, %v1778_v16 }
 0x470   :  { %v891_v18 = vrot.slane %v877_v14, %v1778_v16  ;;  %v900_v19 = vrot.slane %v884_v15, %v1778_v16  ;;  %v892_v8 = vcombine.high %v884_v15, %v884_v15 }
 0x472   :  { %v893_v22 = vcombine.high %v891_v18, %v891_v18  ;;  %v929_v23 = vrot.slane %v900_v19, %v1784_v20  ;;  %v922_v24 = vcombine.high %v900_v19, %v900_v19  ;;  %v907_v26 = vrot.slane %v891_v18, %v1778_v16 }
 0x473   :  { %v914_v31 = vrot.slane %v892_v8, %v1778_v16 }
 0x474   :  { %v966_v28 = vadd.f32 %v929_v23, %v2063_v43  ;;  %v937_v29 = vrot.slane %v922_v24, %v1784_v20  ;;  %v921_v30 = vrot.slane %v893_v22, %v1778_v16  ;;  %v967_v34 = vadd.f32 %v929_v23, %v2070_v25 }
 0x475   :  { %v923_v46 = vcombine.high %v907_v26, %v907_v26  ;;  %v968_v47 = vadd.f32 %v929_v23, %v2089_v41  ;;  %v933_v0 = vrot.slane %v914_v31, %v1784_v20  ;;  %v945_v7 = vrot.slane %v907_v26, %v1784_v20 }
 0x476   :  { %v991_v32 = vsel %vm990_vm13, %v966_v28, -inf  ;;  %v972_v33 = vadd.f32 %v937_v29, %v2063_v43  ;;  %v2083_v38 = vrot.slane %v921_v30, %v1784_v20  ;;  %v994_v36 = vsel %vm990_vm13, %v967_v34, -inf }
 0x477   :  { %992 = vmax.xlane.f32.xlu1 %v991_v32  ;;  %v953_v53 = vrot.slane %v923_v46, %v1784_v20  ;;  %v925_v54 = vcombine.high %v921_v30, %v921_v30  ;;  %v997_v50 = vsel %vm990_vm13, %v968_v47, -inf  ;;  %v969_v2 = vadd.f32 %v933_v0, %v2063_v43 }
 0x478   :  { %v1009_v42 = vsel %vm990_vm13, %v972_v33, -inf  ;;  %v981_v44 = vadd.f32 %v2083_v38, %v2063_v43  ;;  %v983_v35 = vadd.f32 %v2083_v38, %v2089_v41  ;;  %v970_v45 = vadd.f32 %v933_v0, %v2070_v25 }
 0x479   :  { %1010 = vmax.xlane.f32.xlu0 %v1009_v42  ;;  %v985_v56 = vadd.f32 %v953_v53, %v2070_v25  ;;  %v957_v57 = vrot.slane %v925_v54, %v1784_v20  ;;  %v1000_v59 = vsel %vm990_vm13, %v969_v2, -inf  ;;  %v971_v37 = vadd.f32 %v933_v0, %v2089_v41 }
 0x47a   :  { %v1036_v49 = vsel %vm990_vm13, %v981_v44, -inf  ;;  %v1042_v55 = vsel %vm990_vm13, %v983_v35, -inf  ;;  %v1003_v61 = vsel %vm990_vm13, %v970_v45, -inf  ;;  %v973_v63 = vadd.f32 %v937_v29, %v2070_v25 }
 0x47b   :  { %995 = vmax.xlane.f32.xlu1 %v994_v36  ;;  %v1048_v60 = vsel %vm990_vm13, %v985_v56, -inf  ;;  %v987_v51 = vadd.f32 %v957_v57, %v2063_v43  ;;  %v989_v27 = vadd.f32 %v957_v57, %v2089_v41  ;;  %v1006_v62 = vsel %vm990_vm13, %v971_v37, -inf }
 0x47c   :  { %v1012_v3 = vsel %vm990_vm13, %v973_v63, -inf  ;;  %v974_v58 = vadd.f32 %v937_v29, %v2089_v41  ;;  %v978_v13 = vadd.f32 %v945_v7, %v2063_v43  ;;  %v979_v14 = vadd.f32 %v945_v7, %v2070_v25 }
 0x47d   :  { %1037 = vmax.xlane.f32.xlu0 %v1036_v49  ;;  %v1054_v21 = vsel %vm990_vm13, %v987_v51, -inf  ;;  %v1060_v1 = vsel %vm990_vm13, %v989_v27, -inf  ;;  %v924_v15 = vcombine.high %v914_v31, %v914_v31  ;;  %v980_v19 = vadd.f32 %v945_v7, %v2089_v41 }
 0x47e   :  { %v1015_v10 = vsel %vm990_vm13, %v974_v58, -inf  ;;  %v1027_v39 = vsel %vm990_vm13, %v978_v13, -inf  ;;  %v1030_v18 = vsel %vm990_vm13, %v979_v14, -inf  ;;  %v982_v31 = vadd.f32 %v2083_v38, %v2070_v25 }
 0x47f   :  { %998 = vmax.xlane.f32.xlu1 %v997_v50  ;;  %v941_v8 = vrot.slane %v924_v15, %v1784_v20  ;;  %v1033_v22 = vsel %vm990_vm13, %v980_v19, -inf  ;;  %v984_v33 = vadd.f32 %v953_v53, %v2063_v43  ;;  %v986_v42 = vadd.f32 %v953_v53, %v2089_v41 }
 0x480   :  { %v1039_v32 = vsel %vm990_vm13, %v982_v31, -inf  ;;  %v988_v46 = vadd.f32 %v957_v57, %v2070_v25 }
 0x481   :  { %1043 = vmax.xlane.f32.xlu0 %v1042_v55  ;;  %v975_v23 = vadd.f32 %v941_v8, %v2063_v43  ;;  %v976_v26 = vadd.f32 %v941_v8, %v2070_v25  ;;  %v977_v29 = vadd.f32 %v941_v8, %v2089_v41  ;;  %v1045_v34 = vsel %vm990_vm13, %v984_v33, -inf }
 0x482   :  { %v1051_v44 = vsel %vm990_vm13, %v986_v42, -inf  ;;  %v1057_v36 = vsel %vm990_vm13, %v988_v46, -inf  ;;  %v1730_v43 = vmov 40  }
 0x483   :  { %1001 = vmax.xlane.f32.xlu1 %v1000_v59  ;;  %v1018_v24 = vsel %vm990_vm13, %v975_v23, -inf  ;;  %v1021_v28 = vsel %vm990_vm13, %v976_v26, -inf  ;;  %v1024_v30 = vsel %vm990_vm13, %v977_v29, -inf  ;;  %1639 = vset.pattern.permute.xlu0 %v1730_v43 }
 0x484   :  { %1638 = vset.pattern.permute.xlu1 %v1730_v43 }
 0x485   :  { %1049 = vmax.xlane.f32.xlu0 %v1048_v60  ;;  %v1096_v60 = vadd.s32 4294967280, %v1762_v6 }
 0x487   :  { %1004 = vmax.xlane.f32.xlu1 %v1003_v61  ;;  %v2145_v37 = vsub.s32 %v1096_v60, %v1760_v5 }
 0x489   :  { %1055 = vmax.xlane.f32.xlu0 %v1054_v21 }
 0x48b   :  { %1007 = vmax.xlane.f32.xlu1 %v1006_v62 }
 0x48d   :  { %1061 = vmax.xlane.f32.xlu0 %v1060_v1 }
 0x48f   :  { %1013 = vmax.xlane.f32.xlu1 %v1012_v3 }
 0x493   :  { %1016 = vmax.xlane.f32.xlu1 %v1015_v10 }
 0x497   :  { %1028 = vmax.xlane.f32.xlu1 %v1027_v39 }
 0x49b   :  { %1031 = vmax.xlane.f32.xlu1 %v1030_v18 }
 0x49f   :  { %1034 = vmax.xlane.f32.xlu1 %v1033_v22 }
 0x4a3   :  { %1019 = vmax.xlane.f32.xlu1 %v1018_v24 }
 0x4a7   :  { %1022 = vmax.xlane.f32.xlu1 %v1021_v28 }
 0x4ab   :  { %1025 = vmax.xlane.f32.xlu1 %v1024_v30 }
 0x4af   :  { %1040 = vmax.xlane.f32.xlu1 %v1039_v32 }
 0x4b3   :  { %1046 = vmax.xlane.f32.xlu1 %v1045_v34 }
 0x4b7   :  { %1052 = vmax.xlane.f32.xlu1 %v1051_v44 }
 0x4bb   :  { %1058 = vmax.xlane.f32.xlu1 %v1057_v36 }
 0x500   :  { %v993_v38 = vpop.xlane.xlu1 %992 }
 0x501   :  { %v1090_v39 = vrot.slane %v993_v38, %v1869_v52 }
 0x502   :  { %v1011_v55 = vpop.xlane.xlu0 %1010 }
 0x503   :  { %v1120_v7 = vrot.slane %v1011_v55, %v1869_v52 }
 0x504   :  { %v996_v47 = vpop.xlane.xlu1 %995 }
 0x505   :  { %v1094_v1 = vrot.slane %v996_v47, %v1865_v48 }
 0x506   :  { %v1038_v25 = vpop.xlane.xlu0 %1037 }
 0x507   :  { %v1095_v23 = vsel %vm265_vm15, %v1094_v1, %v1090_v39  ;;  %v1162_v24 = vrot.slane %v1038_v25, %v1869_v52 }
 0x508   :  { %v999_v0 = vpop.xlane.xlu1 %998 }
 0x509   :  { %v1100_v5 = vrot.slane %v999_v0, %v2145_v37 }
 0x50a   :  { %v1044_v45 = vpop.xlane.xlu0 %1043 }
 0x50b   :  { %v1102_v29 = vsel %vm1101_vm7, %v1100_v5, %v1095_v23  ;;  %v1171_v36 = vrot.slane %v1044_v45, %v2145_v37 }
 0x50c   :  { %v1002_v49 = vpop.xlane.xlu1 %1001 }
 0x50d   :  { %v1106_v3 = vrot.slane %v1002_v49, %v1869_v52 }
 0x50e   :  { %v1050_v61 = vpop.xlane.xlu0 %1049 }
 0x50f   :  { %v1180_v38 = vrot.slane %v1050_v61, %v1865_v48 }
 0x510   :  { %v1005_v35 = vpop.xlane.xlu1 %1004 }
 0x511   :  { %v1110_v27 = vrot.slane %v1005_v35, %v1865_v48 }
 0x512   :  { %v1056_v15 = vpop.xlane.xlu0 %1055 }
 0x513   :  { %v1111_v14 = vsel %vm265_vm15, %v1110_v27, %v1106_v3 }
 0x514   :  { %v1008_v54 = vpop.xlane.xlu1 %1007 }
 0x515   :  { %v1115_v62 = vrot.slane %v1008_v54, %v2145_v37 }
 0x516   :  { %v1062_v49 = vpop.xlane.xlu0 %1061 }
 0x517   :  { %v1116_v8 = vsel %vm1101_vm7, %v1115_v62, %v1111_v14 }
 0x518   :  { %v1014_v50 = vpop.xlane.xlu1 %1013  ;;  %v1201_v34 = vsel %vm330_vm0, %v1116_v8, %v1102_v29 }
 0x519   :  { %v1124_v63 = vrot.slane %v1014_v50, %v1865_v48 }
 0x51b   :  { %v1125_v22 = vsel %vm265_vm15, %v1124_v63, %v1120_v7 }
 0x51c   :  { %v1017_v41 = vpop.xlane.xlu1 %1016 }
 0x51d   :  { %v1129_v58 = vrot.slane %v1017_v41, %v2145_v37 }
 0x51f   :  { %v1130_v26 = vsel %vm1101_vm7, %v1129_v58, %v1125_v22  ;;  %v2204_v58 = vsel %vm859_vm12, 1.0, %v1727_v40 }
 0x520   :  { %v1029_v53 = vpop.xlane.xlu1 %1028  ;;  %v1202_v47 = vsel %vm332_vm1, %v1130_v26, %v1201_v34 }
 0x521   :  { %v1148_v0 = vrot.slane %v1029_v53, %v1869_v52  ;;  %v1199_v53 = vrot.slane %v1062_v49, %v2145_v37 }
 0x524   :  { %v1032_v2 = vpop.xlane.xlu1 %1031 }
 0x525   :  { %v1152_v30 = vrot.slane %v1032_v2, %v1865_v48  ;;  %v1190_v2 = vrot.slane %v1056_v15, %v1869_v52 }
 0x527   :  { %v1153_v43 = vsel %vm265_vm15, %v1152_v30, %v1148_v0 }
 0x528   :  { %v1035_v56 = vpop.xlane.xlu1 %1034 }
 0x529   :  { %v1157_v42 = vrot.slane %v1035_v56, %v2145_v37 }
 0x52b   :  { %v1158_v55 = vsel %vm1101_vm7, %v1157_v42, %v1153_v43 }
 0x52c   :  { %v1020_v57 = vpop.xlane.xlu1 %1019 }
 0x52d   :  { %v1134_v18 = vrot.slane %v1020_v57, %v1869_v52 }
 0x530   :  { %v1023_v59 = vpop.xlane.xlu1 %1022 }
 0x531   :  { %v1138_v6 = vrot.slane %v1023_v59, %v1865_v48 }
 0x533   :  { %v1139_v28 = vsel %vm265_vm15, %v1138_v6, %v1134_v18 }
 0x534   :  { %v1026_v51 = vpop.xlane.xlu1 %1025 }
 0x535   :  { %v1143_v10 = vrot.slane %v1026_v51, %v2145_v37 }
 0x537   :  { %v1144_v31 = vsel %vm1101_vm7, %v1143_v10, %v1139_v28 }
 0x538   :  { %v1041_v21 = vpop.xlane.xlu1 %1040  ;;  %v1203_v35 = vsel %vm334_vm2, %v1144_v31, %v1202_v47 }
 0x539   :  { %v1166_v19 = vrot.slane %v1041_v21, %v1865_v48  ;;  %v1204_v57 = vsel %vm336_vm3, %v1158_v55, %v1203_v35 }
 0x53b   :  { %v1167_v44 = vsel %vm265_vm15, %v1166_v19, %v1162_v24 }
 0x53c   :  { %v1047_v13 = vpop.xlane.xlu1 %1046  ;;  %v1172_v54 = vsel %vm1101_vm7, %v1171_v36, %v1167_v44 }
 0x53d   :  { %v1176_v32 = vrot.slane %v1047_v13, %v1869_v52  ;;  %v1205_v59 = vsel %vm338_vm4, %v1172_v54, %v1204_v57 }
 0x53f   :  { %v1181_v50 = vsel %vm265_vm15, %v1180_v38, %v1176_v32 }
 0x540   :  { %v1053_v33 = vpop.xlane.xlu1 %1052 }
 0x541   :  { %v1185_v46 = vrot.slane %v1053_v33, %v2145_v37 }
 0x543   :  { %v1186_v56 = vsel %vm1101_vm7, %v1185_v46, %v1181_v50 }
 0x544   :  { %v1059_v41 = vpop.xlane.xlu1 %1058  ;;  %v1206_v60 = vsel %vm340_vm5, %v1186_v56, %v1205_v59 }
 0x545   :  { %v1194_v25 = vrot.slane %v1059_v41, %v1865_v48 }
 0x547   :  { %v1195_v45 = vsel %vm265_vm15, %v1194_v25, %v1190_v2 }
 0x548   :  { %v1200_v51 = vsel %vm1101_vm7, %v1199_v53, %v1195_v45 }
 0x549   :  { %v1207_v61 = vsel %vm342_vm6, %v1200_v51, %v1206_v60 }
 0x54a   :  { %v1209_v21 = vsub.f32 %v2041_v11, %v1207_v61  ;;  %v2210_v11 = vsel %vm858_vm9, 1.0, %v1727_v40 }
 0x54c   :  { %v1210_v27 = vmul.f32 1.442695, %v1209_v21 }
 0x54e   :  { %1651 = vpow2.f32 %v1210_v27 }
 0x55b   :  { %v2195_v62 = vpop.eup %1651 }
 0x55c   :  { %v1220_v63 = vrot.slane %v2195_v62, %v1778_v16  ;;  %v1213_v6 = vcombine.high %v2195_v62, %v2195_v62 }
 0x55e   :  { %v1236_v1 = vrot.slane %v1220_v63, %v1778_v16  ;;  %v1228_v3 = vcombine.high %v1220_v63, %v1220_v63  ;;  %v1227_v14 = vrot.slane %v1213_v6, %v1778_v16 }
 0x560   :  { %v1265_v7 = vrot.slane %v1236_v1, %v1784_v20  ;;  %v1250_v5 = vrot.slane %v1228_v3, %v1778_v16  ;;  %v1258_v39 = vcombine.high %v1236_v1, %v1236_v1  ;;  %v1243_v4 = vrot.slane %v1227_v14, %v1778_v16 }
 0x561   :  { %v1229_v34 = vcombine.high %v1227_v14, %v1227_v14 }
 0x562   :  { %v1303_v10 = vmul.f32 %v2204_v58, %v1265_v7  ;;  %v1302_v13 = vmul.f32 %v2210_v11, %v1265_v7  ;;  %v1269_v9 = vrot.slane %v1250_v5, %v1784_v20  ;;  %v1304_v19 = vmul.f32 %v2220_v12, %v1265_v7 }
 0x563   :  { %v1273_v40 = vrot.slane %v1258_v39, %v1784_v20  ;;  %v1281_v26 = vrot.slane %v1243_v4, %v1784_v20  ;;  %v1260_v28 = vcombine.high %v1250_v5, %v1250_v5  ;;  %v1257_v38 = vrot.slane %v1229_v34, %v1778_v16 }
 0x564   :  { %v1329_v15 = vsel %vm990_vm13, %v1303_v10, 0.0  ;;  %v1326_v18 = vsel %vm990_vm13, %v1302_v13, 0.0  ;;  %v1306_v8 = vmul.f32 %v2204_v58, %v1269_v9  ;;  %v1332_v17 = vsel %vm990_vm13, %v1304_v19, 0.0 }
 0x565   :  { %1330 = vadd.xlane.f32.xlu0 %v1329_v15  ;;  %1327 = vadd.xlane.f32.xlu1 %v1326_v18  ;;  %v1307_v23 = vmul.f32 %v2220_v12, %v1269_v9  ;;  %v1305_v24 = vmul.f32 %v2210_v11, %v1269_v9  ;;  %v1309_v31 = vmul.f32 %v2204_v58, %v1273_v40 }
 0x566   :  { %v1338_v22 = vsel %vm990_vm13, %v1306_v8, 0.0  ;;  %v1308_v32 = vmul.f32 %v2210_v11, %v1273_v40  ;;  %v1310_v33 = vmul.f32 %v2220_v12, %v1273_v40  ;;  %v1315_v46 = vmul.f32 %v2204_v58, %v1281_v26 }
 0x567   :  { %v1341_v29 = vsel %vm990_vm13, %v1307_v23, 0.0  ;;  %v1335_v30 = vsel %vm990_vm13, %v1305_v24, 0.0  ;;  %v1347_v42 = vsel %vm990_vm13, %v1309_v31, 0.0  ;;  %v1277_v36 = vrot.slane %v1260_v28, %v1784_v20 }
 0x568   :  { %v1344_v44 = vsel %vm990_vm13, %v1308_v32, 0.0  ;;  %v1350_v47 = vsel %vm990_vm13, %v1310_v33, 0.0  ;;  %v1365_v0 = vsel %vm990_vm13, %v1315_v46, 0.0  ;;  %v1314_v35 = vmul.f32 %v2210_v11, %v1281_v26 }
 0x569   :  { %1333 = vadd.xlane.f32.xlu1 %v1332_v17  ;;  %1339 = vadd.xlane.f32.xlu0 %v1338_v22  ;;  %v1311_v49 = vmul.f32 %v2210_v11, %v1277_v36  ;;  %v1313_v43 = vmul.f32 %v2220_v12, %v1277_v36  ;;  %v1316_v41 = vmul.f32 %v2220_v12, %v1281_v26 }
 0x56a   :  { %v1362_v50 = vsel %vm990_vm13, %v1314_v35, 0.0  ;;  %v1285_v16 = vrot.slane %v1257_v38, %v1784_v20  ;;  %v1312_v2 = vmul.f32 %v2204_v58, %v1277_v36  ;;  %v1259_v53 = vcombine.high %v1243_v4, %v1243_v4 }
 0x56b   :  { %v1353_v54 = vsel %vm990_vm13, %v1311_v49, 0.0  ;;  %v1359_v55 = vsel %vm990_vm13, %v1313_v43, 0.0  ;;  %v1368_v56 = vsel %vm990_vm13, %v1316_v41, 0.0  ;;  %v1261_v59 = vcombine.high %v1257_v38, %v1257_v38 }
 0x56c   :  { %v1317_v25 = vmul.f32 %v2210_v11, %v1285_v16  ;;  %v1356_v57 = vsel %vm990_vm13, %v1312_v2, 0.0  ;;  %v1318_v60 = vmul.f32 %v2204_v58, %v1285_v16  ;;  %v1319_v51 = vmul.f32 %v2220_v12, %v1285_v16 }
 0x56d   :  { %1342 = vadd.xlane.f32.xlu0 %v1341_v29  ;;  %1336 = vadd.xlane.f32.xlu1 %v1335_v30  ;;  %v1289_v61 = vrot.slane %v1259_v53, %v1784_v20  ;;  %v1293_v21 = vrot.slane %v1261_v59, %v1784_v20 }
 0x56e   :  { %v1371_v45 = vsel %vm990_vm13, %v1317_v25, 0.0  ;;  %v1374_v27 = vsel %vm990_vm13, %v1318_v60, 0.0  ;;  %v1377_v63 = vsel %vm990_vm13, %v1319_v51, 0.0 }
 0x56f   :  { %v1320_v1 = vmul.f32 %v2210_v11, %v1289_v61  ;;  %v1321_v3 = vmul.f32 %v2204_v58, %v1289_v61  ;;  %v1322_v5 = vmul.f32 %v2220_v12, %v1289_v61  ;;  %v1323_v10 = vmul.f32 %v2210_v11, %v1293_v21  ;;  %v1701_v11 = vld [vmem:[%s2335_s0] sm:$0xff]  ;;  %s1731_s0 = smov [#allocation2]  }
 0x570   :  { %v1324_v9 = vmul.f32 %v2204_v58, %v1293_v21  ;;  %v1325_v39 = vmul.f32 %v2220_v12, %v1293_v21  ;;  %s1581_s27 = sshll.u32 %s1731_s0, 4  ;;  %s1582_s27 = int_to_ptr.vmem [resolvable:$true] %s1581_s27 }
 0x571   :  { %1348 = vadd.xlane.f32.xlu0 %v1347_v42  ;;  %1345 = vadd.xlane.f32.xlu1 %v1344_v44  ;;  %v1380_v6 = vsel %vm990_vm13, %v1320_v1, 0.0  ;;  %v1383_v7 = vsel %vm990_vm13, %v1321_v3, 0.0  ;;  %v1386_v20 = vsel %vm990_vm13, %v1322_v5, 0.0  ;;  %v1389_v13 = vsel %vm990_vm13, %v1323_v10, 0.0  ;;  %s1702_s28 = scalar_lea.vmem %s1582_s27, 128  ;;  %p1707_p1 = scmp.lt.s32.totalorder %s1582_s27, %s1582_s27 }
 0x572   :  { %v1392_v14 = vsel %vm990_vm13, %v1324_v9, 0.0  ;;  %v1395_v15 = vsel %vm990_vm13, %v1325_v39, 0.0  ;;  %p1703_p0 = scmp.ne.s32.totalorder %s1582_s27, %s1702_s28  ;;  %p1708_p2 = scmp.lt.s32.totalorder %s1702_s28, %s1702_s28 }
 0x574   :  { %p1709_p3 = por %p1708_p2, %p1707_p1 }
 0x575   :  { %1351 = vadd.xlane.f32.xlu1 %v1350_v47  ;;  %1366 = vadd.xlane.f32.xlu0 %v1365_v0 }
 0x576   :  { %p1710_p4 = pnand %p1709_p3, %p1703_p0 }
 0x579   :  { %1354 = vadd.xlane.f32.xlu0 %v1353_v54  ;;  %1363 = vadd.xlane.f32.xlu1 %v1362_v50 }
 0x57d   :  { %1360 = vadd.xlane.f32.xlu0 %v1359_v55  ;;  %1369 = vadd.xlane.f32.xlu1 %v1368_v56 }
 0x581   :  { %1357 = vadd.xlane.f32.xlu1 %v1356_v57  ;;  %1372 = vadd.xlane.f32.xlu0 %v1371_v45 }
 0x585   :  { %1375 = vadd.xlane.f32.xlu1 %v1374_v27  ;;  %1378 = vadd.xlane.f32.xlu0 %v1377_v63 }
 0x589   :  { %1381 = vadd.xlane.f32.xlu1 %v1380_v6  ;;  %1384 = vadd.xlane.f32.xlu0 %v1383_v7 }
 0x58d   :  { %1387 = vadd.xlane.f32.xlu1 %v1386_v20  ;;  %1390 = vadd.xlane.f32.xlu0 %v1389_v13 }
 0x591   :  { %1393 = vadd.xlane.f32.xlu1 %v1392_v14  ;;  %1396 = vadd.xlane.f32.xlu0 %v1395_v15 }
 0x5a2   :  { %1568 = vperm.xlu1 %1638, %v1701_v11  }
 0x5ee   :  { %v1331_v18 = vpop.xlane.xlu0 %1330  ;;  %v1328_v19 = vpop.xlane.xlu1 %1327 }
 0x5ef   :  { %1653 = vrcp.f32 %v1331_v18 }
 0x5f0   :  { %1655 = vrcp.f32 %v1328_v19 }
 0x5f2   :  { %v1334_v8 = vpop.xlane.xlu1 %1333  ;;  %v1340_v40 = vpop.xlane.xlu0 %1339 }
 0x5f3   :  { %1657 = vrcp.f32 %v1334_v8 }
 0x5f4   :  { %1659 = vrcp.f32 %v1340_v40 }
 0x5f6   :  { %v1343_v58 = vpop.xlane.xlu0 %1342  ;;  %v1337_v4 = vpop.xlane.xlu1 %1336 }
 0x5f7   :  { %1661 = vrcp.f32 %v1343_v58 }
 0x5f8   :  { %1663 = vrcp.f32 %v1337_v4 }
 0x5fa   :  { %v1349_v12 = vpop.xlane.xlu0 %1348  ;;  %v1346_v17 = vpop.xlane.xlu1 %1345 }
 0x5fb   :  { %1665 = vrcp.f32 %v1349_v12 }
 0x5fc   :  { %1667 = vrcp.f32 %v1346_v17  ;;  %v1654_v34 = vpop.eup %1653 }
 0x5fd   :  { %v1656_v42 = vpop.eup %1655  ;;  %v1453_v59 = vrot.slane %v1654_v34, %v1865_v48 }
 0x5fe   :  { %v1352_v22 = vpop.xlane.xlu1 %1351  ;;  %v1367_v23 = vpop.xlane.xlu0 %1366  ;;  %v1449_v61 = vrot.slane %v1656_v42, %v1869_v52 }
 0x5ff   :  { %1669 = vrcp.f32 %v1352_v22 }
 0x600   :  { %v1658_v44 = vpop.eup %1657  ;;  %v1454_v14 = vsel %vm265_vm15, %v1453_v59, %v1449_v61 }
 0x601   :  { %v1660_v38 = vpop.eup %1659  ;;  %v1458_v3 = vrot.slane %v1658_v44, %v2145_v37 }
 0x602   :  { %v1355_v24 = vpop.xlane.xlu0 %1354  ;;  %v1364_v26 = vpop.xlane.xlu1 %1363  ;;  %v1467_v45 = vrot.slane %v1660_v38, %v1865_v48 }
 0x603   :  { %1671 = vrcp.f32 %v1355_v24  ;;  %v1459_v8 = vsel %vm1101_vm7, %v1458_v3, %v1454_v14 }
 0x604   :  { %v1662_v47 = vpop.eup %1661 }
 0x605   :  { %v1664_v0 = vpop.eup %1663  ;;  %v1472_v21 = vrot.slane %v1662_v47, %v2145_v37 }
 0x606   :  { %v1361_v28 = vpop.xlane.xlu0 %1360  ;;  %v1370_v29 = vpop.xlane.xlu1 %1369  ;;  %v1463_v25 = vrot.slane %v1664_v0, %v1869_v52 }
 0x608   :  { %v1666_v49 = vpop.eup %1665  ;;  %v1468_v6 = vsel %vm265_vm15, %v1467_v45, %v1463_v25 }
 0x609   :  { %v1668_v54 = vpop.eup %1667  ;;  %v1481_v27 = vrot.slane %v1666_v49, %v1865_v48  ;;  %v1473_v18 = vsel %vm1101_vm7, %v1472_v21, %v1468_v6 }
 0x60a   :  { %v1358_v30 = vpop.xlane.xlu1 %1357  ;;  %v1373_v31 = vpop.xlane.xlu0 %1372  ;;  %v1477_v63 = vrot.slane %v1668_v54, %v1869_v52 }
 0x60b   :  { %1673 = vrcp.f32 %v1358_v30  ;;  %v1558_v30 = vsel %vm330_vm0, %v1473_v18, %v1459_v8 }
 0x60c   :  { %1675 = vrcp.f32 %v1364_v26  ;;  %v1670_v50 = vpop.eup %1669  ;;  %v1482_v15 = vsel %vm265_vm15, %v1481_v27, %v1477_v63 }
 0x60d   :  { %1677 = vrcp.f32 %v1361_v28  ;;  %v1486_v7 = vrot.slane %v1670_v50, %v2145_v37 }
 0x60e   :  { %v1376_v32 = vpop.xlane.xlu1 %1375  ;;  %v1379_v33 = vpop.xlane.xlu0 %1378  ;;  %1679 = vrcp.f32 %v1373_v31 }
 0x60f   :  { %1681 = vrcp.f32 %v1376_v32  ;;  %v1487_v4 = vsel %vm1101_vm7, %v1486_v7, %v1482_v15 }
 0x610   :  { %1683 = vrcp.f32 %v1379_v33  ;;  %v1672_v41 = vpop.eup %1671  ;;  %v1559_v33 = vsel %vm332_vm1, %v1487_v4, %v1558_v30 }
 0x611   :  { %v1491_v5 = vrot.slane %v1672_v41, %v1869_v52 }
 0x612   :  { %v1382_v46 = vpop.xlane.xlu1 %1381  ;;  %v1385_v36 = vpop.xlane.xlu0 %1384 }
 0x613   :  { %1685 = vrcp.f32 %v1382_v46 }
 0x614   :  { %1687 = vrcp.f32 %v1385_v36 }
 0x615   :  { %1689 = vrcp.f32 %v1370_v29 }
 0x616   :  { %1691 = vrcp.f32 %v1367_v23  ;;  %v1388_v35 = vpop.xlane.xlu1 %1387  ;;  %v1391_v43 = vpop.xlane.xlu0 %1390 }
 0x617   :  { %1693 = vrcp.f32 %v1388_v35 }
 0x618   :  { %1695 = vrcp.f32 %v1391_v43  ;;  %v1674_v16 = vpop.eup %1673 }
 0x619   :  { %v1676_v56 = vpop.eup %1675  ;;  %v1495_v60 = vrot.slane %v1674_v16, %v1865_v48 }
 0x61a   :  { %v1394_v2 = vpop.xlane.xlu1 %1393  ;;  %v1397_v55 = vpop.xlane.xlu0 %1396  ;;  %v1505_v40 = vrot.slane %v1676_v56, %v1869_v52 }
 0x61b   :  { %1697 = vrcp.f32 %v1394_v2  ;;  %v1678_v53 = vpop.eup %1677  ;;  %v1496_v9 = vsel %vm265_vm15, %v1495_v60, %v1491_v5 }
 0x61c   :  { %1699 = vrcp.f32 %v1397_v55  ;;  %v1680_v57 = vpop.eup %1679  ;;  %v1500_v11 = vrot.slane %v1678_v53, %v2145_v37 }
 0x61d   :  { %v1682_v51 = vpop.eup %1681  ;;  %v1519_v58 = vrot.slane %v1680_v57, %v1869_v52 }
 0x61e   :  { %v1684_v1 = vpop.eup %1683  ;;  %v1523_v13 = vrot.slane %v1682_v51, %v1865_v48  ;;  %v1501_v24 = vsel %vm1101_vm7, %v1500_v11, %v1496_v9  ;;  %v1569_v55 = vpop.permute.xlu1 %1568 }
 0x61f   :  { %v1528_v17 = vrot.slane %v1684_v1, %v2145_v37  ;;  %v1560_v34 = vsel %vm334_vm2, %v1501_v24, %v1559_v33 }
 0x620   :  { %v1686_v10 = vpop.eup %1685  ;;  %v1524_v28 = vsel %vm265_vm15, %v1523_v13, %v1519_v58 }
 0x621   :  { %v1688_v20 = vpop.eup %1687  ;;  %v1533_v22 = vrot.slane %v1686_v10, %v1869_v52  ;;  %v1529_v46 = vsel %vm1101_vm7, %v1528_v17, %v1524_v28 }
 0x622   :  { %v1690_v39 = vpop.eup %1689  ;;  %v1537_v23 = vrot.slane %v1688_v20, %v1865_v48 }
 0x623   :  { %v1692_v19 = vpop.eup %1691  ;;  %v1514_v26 = vrot.slane %v1690_v39, %v2145_v37 }
 0x624   :  { %v1694_v12 = vpop.eup %1693  ;;  %v1509_v32 = vrot.slane %v1692_v19, %v1865_v48  ;;  %v1538_v36 = vsel %vm265_vm15, %v1537_v23, %v1533_v22 }
 0x625   :  { %v1542_v29 = vrot.slane %v1694_v12, %v2145_v37  ;;  %v1696_v31 = vpop.eup %1695 }
 0x626   :  { %v1510_v44 = vsel %vm265_vm15, %v1509_v32, %v1505_v40  ;;  %v1547_v35 = vrot.slane %v1696_v31, %v1869_v52 }
 0x627   :  { %v1515_v47 = vsel %vm1101_vm7, %v1514_v26, %v1510_v44  ;;  %v1543_v0 = vsel %vm1101_vm7, %v1542_v29, %v1538_v36 }
 0x628   :  { %v1698_v42 = vpop.eup %1697  ;;  %v1561_v43 = vsel %vm336_vm3, %v1515_v47, %v1560_v34 }
 0x629   :  { %v1700_v38 = vpop.eup %1699  ;;  %v1551_v49 = vrot.slane %v1698_v42, %v1865_v48  ;;  %v1562_v50 = vsel %vm338_vm4, %v1529_v46, %v1561_v43 }
 0x62a   :  { %v1556_v54 = vrot.slane %v1700_v38, %v2145_v37  ;;  %v1563_v16 = vsel %vm340_vm5, %v1543_v0, %v1562_v50 }
 0x62b   :  { %v1552_v41 = vsel %vm265_vm15, %v1551_v49, %v1547_v35 }
 0x62c   :  { %v1557_v2 = vsel %vm1101_vm7, %v1556_v54, %v1552_v41 }
 0x62d   :  { %v1564_v56 = vsel %vm342_vm6, %v1557_v2, %v1563_v16 }
 0x62e   :  { %v1566_v25 = vmul.f32 %v2195_v62, %v1564_v56 }
 0x630   :  { %v1571_v48 = vmul.f32 %v1569_v55, %v1566_v25 }
 0x632   :  { %v1604_v52 = vadd.f32 -0.3, %v1571_v48 }
 0x634   :  { %v1573_v53 = vmul.f32 3.1622777, %v1604_v52 }
 0x636   :  { %1574 = vst.msk [vmem:[#allocation2] sm:$0xff] %vm990_vm13, %v1573_v53 }
 0x637   :  { %1713 = shalt.err (!%p1710_p4)
}
 0x638   :  { %1584 = dma.vmem_to_hbm [thread:$0]  %s1582_s27, 128, %s2338_s3, [#allocation3]  }
 0x639   :  { %1722 = dma.done.wait [#allocation3], 128  }
 0x63a   :  { %1723 = vsyncadd [#allocation3], 4294967168 }
 0x63b   :  { %1588 = vsyncpa [#allocation3], 1 }

</bundles_post_ra>
